<compile_context>
chip_gen: v6e
topology: v6e:2x2x1
jax: 0.10.0
libtpu: 0.0.40
codegen_flags: <defaults>
</compile_context>

<pallas_src>
import jax
import jax.numpy as jnp
from jax.experimental import pallas as pl
from jax.experimental.pallas import tpu as pltpu


def make_pool_kernel(hw_true, thw, lw, nchunks, needs_mask):
    """Streaming avg/max pooling over the HW axis.

    hw_true:    true spatial length H*W
    thw:        HW tile length (block lane extent), multiple of 128 when streaming
    lw:         lane width of the accumulator scratch (128 when streaming, thw otherwise)
    nchunks:    thw // lw
    needs_mask: last HW tile extends past hw_true
    """
    inv_hw = 1.0 / float(hw_true)

    def kernel(x_ref, avg_ref, max_ref, sum_acc, max_acc):
        # x_ref: (tb, tc, thw)        avg_ref / max_ref: (tb, tc)
        # sum_acc / max_acc: (tb, tc, lw) f32 VMEM scratch (persist across HW axis)
        k = pl.program_id(2)
        nk = pl.num_programs(2)

        @pl.when(k == 0)
        def _init():
            sum_acc[...] = jnp.zeros_like(sum_acc)
            max_acc[...] = jnp.full_like(max_acc, -jnp.inf)

        def accum_chunk(chunk):
            # pure VPU elementwise work; no cross-lane reduce on the steady-state path
            sum_acc[...] += chunk
            max_acc[...] = jnp.maximum(max_acc[...], chunk)

        def accumulate_full():
            for j in range(nchunks):
                chunk = x_ref[:, :, pl.ds(j * lw, lw)].astype(jnp.float32)
                accum_chunk(chunk)

        if needs_mask:
            rem = hw_true % thw  # valid length of the last HW tile (static, 0 < rem < thw)

            @pl.when(k < nk - 1)
            def _steady():
                accumulate_full()

            @pl.when(k == nk - 1)
            def _last():
                for j in range(nchunks):
                    lo = j * lw
                    if lo >= rem:
                        # chunk entirely past the end of the feature map: contributes nothing
                        break
                    chunk = x_ref[:, :, pl.ds(lo, lw)].astype(jnp.float32)
                    if lo + lw <= rem:
                        accum_chunk(chunk)
                    else:
                        # single boundary chunk: mask pad lanes (0 for sum, -inf for max)
                        lane = jax.lax.broadcasted_iota(jnp.int32, (1, 1, lw), 2)
                        valid = lane < (rem - lo)
                        sum_acc[...] += jnp.where(valid, chunk, 0.0)
                        max_acc[...] = jnp.maximum(
                            max_acc[...], jnp.where(valid, chunk, -jnp.inf)
                        )
        else:
            accumulate_full()

        @pl.when(k == nk - 1)
        def _finalize():
            # one cross-lane reduce per (batch, channel) tile, off the steady-state path
            avg_ref[...] = (jnp.sum(sum_acc[...], axis=-1) * inv_hw).astype(avg_ref.dtype)
            max_ref[...] = jnp.max(max_acc[...], axis=-1).astype(max_ref.dtype)

    return kernel


def make_mlp_kernel(tbm):
    """sigmoid(MLP(avg) + MLP(max)) with the two shared-MLP passes stacked on the MXU."""

    def kernel(avg_ref, max_ref, w1_ref, b1_ref, w2_ref, b2_ref, out_ref):
        avg = avg_ref[...].astype(jnp.float32)          # (tbm, C)
        mx = max_ref[...].astype(jnp.float32)           # (tbm, C)
        w1 = w1_ref[...].astype(jnp.float32)            # (C, mid)
        b1 = b1_ref[...].astype(jnp.float32)            # (1, mid)
        w2 = w2_ref[...].astype(jnp.float32)            # (mid, C)
        b2 = b2_ref[...].astype(jnp.float32)            # (1, C)

        v = jnp.concatenate([avg, mx], axis=0)                            # (2*tbm, C)
        h = jnp.dot(v, w1, preferred_element_type=jnp.float32) + b1       # (2*tbm, mid)
        h = jnp.maximum(h, 0.0)                                           # ReLU
        y = jnp.dot(h, w2, preferred_element_type=jnp.float32) + b2       # (2*tbm, C)
        logits = y[:tbm] + y[tbm:]                                        # (tbm, C)
        out_ref[...] = (1.0 / (1.0 + jnp.exp(-logits))).astype(out_ref.dtype)

    return kernel


def channel_attention(x, w1, b1, w2, b2, *, thw=None, tb=None, tc=None):
    """x: (B, C, H, W) NCHW. w1: (mid, C), b1: (mid,), w2: (C, mid), b2: (C,)
    (PyTorch Linear weight convention: (out_features, in_features)).
    Returns (B, C, 1, 1) in x.dtype."""
    B, C, H, W = x.shape
    HW = H * W
    mid = w1.shape[0]

    x3 = x.reshape(B, C, HW)
    # Pre-transpose weights to (in, out) for row-major MXU matmuls in the kernel.
    w1_t = jnp.transpose(w1)           # (C, mid)
    w2_t = jnp.transpose(w2)           # (mid, C)
    b1_2d = b1.reshape(1, -1)          # (1, mid)
    b2_2d = b2.reshape(1, -1)          # (1, C)

    # --- tile sizes (generation-safe defaults) -------------------------------
    if tb is None:
        tb = B if B <= 8 else 8                     # batch tile
    if tc is None:
        tc = C if C <= 128 else 128                 # channel tile (>=2 tiles at C=256)
    if thw is None:
        thw = HW if HW <= 1024 else 1024            # lane-dense stream tile (mult of 128)
    needs_mask = (HW % thw) != 0

    # Lane width of the elementwise accumulators.
    if thw % 128 == 0:
        lw, nchunks = 128, thw // 128
    else:                                           # small-HW single-step case only
        lw, nchunks = thw, 1

    grid = (pl.cdiv(B, tb), pl.cdiv(C, tc), pl.cdiv(HW, thw))
    pool_kernel = make_pool_kernel(HW, thw, lw, nchunks, needs_mask)

    avg, mx = pl.pallas_call(
        pool_kernel,
        out_shape=(
            jax.ShapeDtypeStruct((B, C), jnp.float32),
            jax.ShapeDtypeStruct((B, C), jnp.float32),
        ),
        grid_spec=pltpu.PrefetchScalarGridSpec(
            num_scalar_prefetch=0,
            grid=grid,
            in_specs=[
                # x: streamed tile per (batch_tile, channel_tile, hw_tile)
                pl.BlockSpec((tb, tc, thw), lambda i, j, k: (i, j, k)),
            ],
            out_specs=[
                # constant block index across k -> resident output target
                pl.BlockSpec((tb, tc), lambda i, j, k: (i, j)),
                pl.BlockSpec((tb, tc), lambda i, j, k: (i, j)),
            ],
            scratch_shapes=[
                pltpu.VMEM((tb, tc, lw), jnp.float32),   # running sum (lane-width)
                pltpu.VMEM((tb, tc, lw), jnp.float32),   # running max (lane-width)
            ],
        ),
        compiler_params=pltpu.CompilerParams(
            dimension_semantics=("parallel", "parallel", "arbitrary"),
            vmem_limit_bytes=32 * 1024 * 1024,   # safe on v5e/v6e/v7x; tiles sized well under this
        ),
    )(x3)

    # --- tiny MLP + sigmoid epilogue (off the critical path) -----------------
    tbm = B if B <= 128 else 128
    out = pl.pallas_call(
        make_mlp_kernel(tbm),
        out_shape=jax.ShapeDtypeStruct((B, C), x.dtype),
        grid_spec=pltpu.PrefetchScalarGridSpec(
            num_scalar_prefetch=0,
            grid=(pl.cdiv(B, tbm),),
            in_specs=[
                pl.BlockSpec((tbm, C), lambda i: (i, 0)),
                pl.BlockSpec((tbm, C), lambda i: (i, 0)),
                # weights/biases: constant block index -> fetched once, kept resident
                pl.BlockSpec((C, mid), lambda i: (0, 0)),
                pl.BlockSpec((1, mid), lambda i: (0, 0)),
                pl.BlockSpec((mid, C), lambda i: (0, 0)),
                pl.BlockSpec((1, C), lambda i: (0, 0)),
            ],
            out_specs=pl.BlockSpec((tbm, C), lambda i: (i, 0)),
        ),
        compiler_params=pltpu.CompilerParams(
            dimension_semantics=("parallel",),
        ),
    )(avg, mx, w1_t, b1_2d, w2_t, b2_2d)

    return out.reshape(B, C, 1, 1)


def reference(x, w1, b1, w2, b2):
    """Pure-JAX reference mirroring the PyTorch forward."""
    avg = jnp.mean(x, axis=(2, 3))
    mx = jnp.max(x, axis=(2, 3))

    def mlp(v):
        h = jnp.maximum(v @ w1.T + b1, 0.0)
        return h @ w2.T + b2

    B, C = avg.shape
    return jax.nn.sigmoid(mlp(avg) + mlp(mx)).reshape(B, C, 1, 1)


if __name__ == "__main__":
    # Module defaults: channel=256, reduction=16 -> mid_channel=16
    B, C, H, W = 2, 256, 8, 8
    mid = C // 16

    key = jax.random.PRNGKey(0)
    kx, k1, k2, k3, k4 = jax.random.split(key, 5)

    x = jax.random.normal(kx, (B, C, H, W), dtype=jnp.float32)
    # Deterministic synthetic parameters (PyTorch Linear shapes: (out, in) and (out,))
    w1 = jax.random.normal(k1, (mid, C), dtype=jnp.float32) * (1.0 / jnp.sqrt(C))
    b1 = jax.random.normal(k2, (mid,), dtype=jnp.float32) * 0.01
    w2 = jax.random.normal(k3, (C, mid), dtype=jnp.float32) * (1.0 / jnp.sqrt(mid))
    b2 = jax.random.normal(k4, (C,), dtype=jnp.float32) * 0.01

    out = channel_attention(x, w1, b1, w2, b2)
    out = jax.block_until_ready(out)

    ref = jax.block_until_ready(reference(x, w1, b1, w2, b2))
    assert out.shape == (B, C, 1, 1)
    assert jnp.allclose(out, ref, atol=1e-5, rtol=1e-5), float(jnp.max(jnp.abs(out - ref)))

    # Exercise the streaming + masked-last-tile path (HW > 1024, not a multiple of 1024).
    H2, W2 = 36, 36                      # HW = 1296 -> thw=1024, partial last tile masked
    x_big = jax.random.normal(kx, (B, C, H2, W2), dtype=jnp.float32)
    out_big = jax.block_until_ready(channel_attention(x_big, w1, b1, w2, b2))
    ref_big = jax.block_until_ready(reference(x_big, w1, b1, w2, b2))
    assert jnp.allclose(out_big, ref_big, atol=1e-5, rtol=1e-5), float(
        jnp.max(jnp.abs(out_big - ref_big))
    )

    print("KERNEL_OK")
</pallas_src>

<mosaic_0001>
module attributes {stable_mosaic.version = 11 : i64} {
  func.func @kernel(%arg0: i32, %arg1: i32, %arg2: i32, %arg3: memref<2x128x64xf32, #tpu.memory_space<vmem>>, %arg4: memref<2x128xf32, #tpu.memory_space<vmem>>, %arg5: memref<2x128xf32, #tpu.memory_space<vmem>>, %arg6: memref<2x128x64xf32, #tpu.memory_space<vmem>>, %arg7: memref<2x128x64xf32, #tpu.memory_space<vmem>>) attributes {dimension_semantics = [#tpu.dimension_semantics<parallel>, #tpu.dimension_semantics<parallel>, #tpu.dimension_semantics<arbitrary>], iteration_bounds = array<i64: 1, 2, 1>, scalar_prefetch = 0 : i64, scratch_operands = 2 : i64, tpu.core_type = #tpu.core_type<tc>, window_params = [{transform_indices = @transform_0, window_bounds = array<i64: 2, 128, 64>}, {transform_indices = @transform_1, window_bounds = array<i64: 2, 128>}, {transform_indices = @transform_2, window_bounds = array<i64: 2, 128>}]} {
    %c0_i32 = arith.constant 0 : i32
    %0 = arith.cmpi eq, %arg2, %c0_i32 : i32
    %1 = arith.extui %0 : i1 to i32
    %c0_i32_0 = arith.constant 0 : i32
    %2 = arith.cmpi ne, %1, %c0_i32_0 : i32
    scf.if %2 {
      %cst = arith.constant 0.000000e+00 : f32
      %13 = vector.broadcast %cst : f32 to vector<2x128x64xf32>
      %c0_17 = arith.constant 0 : index
      %c0_18 = arith.constant 0 : index
      %c0_19 = arith.constant 0 : index
      %14 = vector.load %arg6[%c0_17, %c0_18, %c0_19] : memref<2x128x64xf32, #tpu.memory_space<vmem>>, vector<2x128x64xf32>
      tpu.vector_store %arg6[%c0_17, %c0_18, %c0_19], %13 {strides = array<i32>} : memref<2x128x64xf32, #tpu.memory_space<vmem>>, vector<2x128x64xf32>,
      %cst_20 = arith.constant 0xFF800000 : f32
      %15 = vector.broadcast %cst_20 : f32 to vector<2x128x64xf32>
      %c0_21 = arith.constant 0 : index
      %c0_22 = arith.constant 0 : index
      %c0_23 = arith.constant 0 : index
      %16 = vector.load %arg7[%c0_21, %c0_22, %c0_23] : memref<2x128x64xf32, #tpu.memory_space<vmem>>, vector<2x128x64xf32>
      tpu.vector_store %arg7[%c0_21, %c0_22, %c0_23], %15 {strides = array<i32>} : memref<2x128x64xf32, #tpu.memory_space<vmem>>, vector<2x128x64xf32>,
    } else {
    }
    %c0 = arith.constant 0 : index
    %c0_1 = arith.constant 0 : index
    %c0_2 = arith.constant 0 : index
    %3 = vector.load %arg3[%c0, %c0_1, %c0_2] : memref<2x128x64xf32, #tpu.memory_space<vmem>>, vector<2x128x64xf32>
    %c0_3 = arith.constant 0 : index
    %c0_4 = arith.constant 0 : index
    %c0_5 = arith.constant 0 : index
    %4 = vector.load %arg6[%c0_3, %c0_4, %c0_5] : memref<2x128x64xf32, #tpu.memory_space<vmem>>, vector<2x128x64xf32>
    %5 = arith.addf %4, %3 : vector<2x128x64xf32>
    %c0_6 = arith.constant 0 : index
    %c0_7 = arith.constant 0 : index
    %c0_8 = arith.constant 0 : index
    %6 = vector.load %arg6[%c0_6, %c0_7, %c0_8] : memref<2x128x64xf32, #tpu.memory_space<vmem>>, vector<2x128x64xf32>
    tpu.vector_store %arg6[%c0_6, %c0_7, %c0_8], %5 {strides = array<i32>} : memref<2x128x64xf32, #tpu.memory_space<vmem>>, vector<2x128x64xf32>,
    %c0_9 = arith.constant 0 : index
    %c0_10 = arith.constant 0 : index
    %c0_11 = arith.constant 0 : index
    %7 = vector.load %arg7[%c0_9, %c0_10, %c0_11] : memref<2x128x64xf32, #tpu.memory_space<vmem>>, vector<2x128x64xf32>
    %8 = arith.maximumf %7, %3 : vector<2x128x64xf32>
    %c0_12 = arith.constant 0 : index
    %c0_13 = arith.constant 0 : index
    %c0_14 = arith.constant 0 : index
    %9 = vector.load %arg7[%c0_12, %c0_13, %c0_14] : memref<2x128x64xf32, #tpu.memory_space<vmem>>, vector<2x128x64xf32>
    tpu.vector_store %arg7[%c0_12, %c0_13, %c0_14], %8 {strides = array<i32>} : memref<2x128x64xf32, #tpu.memory_space<vmem>>, vector<2x128x64xf32>,
    %c0_i32_15 = arith.constant 0 : i32
    %10 = arith.cmpi eq, %arg2, %c0_i32_15 : i32
    %11 = arith.extui %10 : i1 to i32
    %c0_i32_16 = arith.constant 0 : i32
    %12 = arith.cmpi ne, %11, %c0_i32_16 : i32
    scf.if %12 {
      %c0_17 = arith.constant 0 : index
      %c0_18 = arith.constant 0 : index
      %c0_19 = arith.constant 0 : index
      %13 = vector.load %arg6[%c0_17, %c0_18, %c0_19] : memref<2x128x64xf32, #tpu.memory_space<vmem>>, vector<2x128x64xf32>
      %cst = arith.constant dense<0.000000e+00> : vector<2x128xf32>
      %14 = vector.multi_reduction <add>, %13, %cst [2] : vector<2x128x64xf32> to vector<2x128xf32>
      %cst_20 = arith.constant 1.562500e-02 : f32
      %15 = vector.broadcast %cst_20 : f32 to vector<2x128xf32>
      %16 = arith.mulf %14, %15 : vector<2x128xf32>
      %c0_21 = arith.constant 0 : index
      %c0_22 = arith.constant 0 : index
      %17 = vector.load %arg4[%c0_21, %c0_22] : memref<2x128xf32, #tpu.memory_space<vmem>>, vector<2x128xf32>
      tpu.vector_store %arg4[%c0_21, %c0_22], %16 {strides = array<i32>} : memref<2x128xf32, #tpu.memory_space<vmem>>, vector<2x128xf32>,
      %c0_23 = arith.constant 0 : index
      %c0_24 = arith.constant 0 : index
      %c0_25 = arith.constant 0 : index
      %18 = vector.load %arg7[%c0_23, %c0_24, %c0_25] : memref<2x128x64xf32, #tpu.memory_space<vmem>>, vector<2x128x64xf32>
      %cst_26 = arith.constant dense<0xFF800000> : vector<2x128xf32>
      %19 = vector.multi_reduction <maximumf>, %18, %cst_26 [2] : vector<2x128x64xf32> to vector<2x128xf32>
      %c0_27 = arith.constant 0 : index
      %c0_28 = arith.constant 0 : index
      %20 = vector.load %arg5[%c0_27, %c0_28] : memref<2x128xf32, #tpu.memory_space<vmem>>, vector<2x128xf32>
      tpu.vector_store %arg5[%c0_27, %c0_28], %19 {strides = array<i32>} : memref<2x128xf32, #tpu.memory_space<vmem>>, vector<2x128xf32>,
    } else {
    }
    return
  }
  func.func @transform_0(%arg0: i32, %arg1: i32, %arg2: i32) -> (i32, i32, i32) {
    %c0_i32 = arith.constant 0 : i32
    return %arg0, %arg1, %arg2 : i32, i32, i32
  }
  func.func @transform_1(%arg0: i32, %arg1: i32, %arg2: i32) -> (i32, i32) {
    %c0_i32 = arith.constant 0 : i32
    return %arg0, %arg1 : i32, i32
  }
  func.func @transform_2(%arg0: i32, %arg1: i32, %arg2: i32) -> (i32, i32) {
    %c0_i32 = arith.constant 0 : i32
    return %arg0, %arg1 : i32, i32
  }
}

</mosaic_0001>

<bundles_post_ra>
// kernel: tpu_custom_call.1
= control target key start
LH: loop header
LB: loop body
LE: loop exit
PB: predicated region body
PF: predicated region fallthrough
CT: control target
= control target key end

     0   :  { %8 = vsyncpa [#allocation6], 0  ;;  %s2497_s0 = inlined_call_operand.vmem [shape: f32[2,256,64], index: 0, kind: input, shape index: {}]   ;;  %s2498_s1 = inlined_call_operand.hbm [shape: f32[2,256], index: 1, kind: output, shape index: {0}]   ;;  %s2499_s2 = inlined_call_operand.hbm [shape: f32[2,256], index: 2, kind: output, shape index: {1}]  }
   0x1   :  { %10 = vsyncpa [#allocation6 + $0x1], 0 }
   0x2   :  { %11 = vsyncpa [#allocation8], 0 }
   0x3   :  { %13 = vsyncpa [#allocation8 + $0x1], 0  ;;  %s1709_s9 = smov 0   ;;  %s1711_s10 = smov 0  }
   0x4   :  { %s1713_s11 = smov 0   ;;  %s1715_s12 = smov 0  }
   0x5   :  { %s1717_s13 = smov 0   ;;  %s1719_s14 = smov 0  }
   0x6 LB: > { %s1502_s15 = sadd.s32 4294967295, %s1688_s14   ;;  %s1503_s16 = sadd.s32 4294967294, %s1688_s14   ;;  %s1688_s14 = sphi %s1719_s14, %s19_s14   ;;  %s1684_s13 = sphi %s1717_s13, %s2506_s13   ;;  %s1680_s12 = sphi %s1715_s12, %s2505_s12   ;;  %s1676_s11 = sphi %s1713_s11, %s2504_s11   ;;  %s1672_s10 = sphi %s1711_s10, %s2503_s10   ;;  %s1668_s9 = sphi %s1709_s9, %s2502_s9  }
   0x7   : > { %s34_s17 = sadd.s32 1, %s1684_s13  ;;  %s49_s18 = sadd.s32 1, %s1676_s11 }
   0x8   : > { %p36_p0 = scmp.ge.s32.totalorder %s34_s17, 2  ;;  %p56_p1 = scmp.ne.s32.totalorder %s1676_s11, %s1672_s10 }
   0x9   : > { %p57_p2 = scmp.eq.s32.totalorder %s1688_s14, 0  ;;  %p88_p3 = scmp.eq.s32.totalorder %s1502_s15, 1 }
   0xa   : > { %s2508_s17 = smov (%p36_p0, %s34_s17), 0  ;;  %p93_p6 = scmp.ne.s32.totalorder %s1672_s10, %s1668_s9 }
   0xb   : > { %p58_p4 = por %p57_p2, %p56_p1  ;;  %p1748_p5 = por %p88_p3, %p56_p1 }
   0xc   : > { %s43_s20 = ssub.s32 %s1684_s13, %s2508_s17  ;;  %p94_p8 = scmp.eq.s32.totalorder %s1503_s16, 1 }
   0xd   : > { %p47_p7 = scmp.eq.s32.totalorder %s43_s20, 0  ;;  %p1505_p10 = scmp.ge.s32.totalorder %s1688_s14, 2 }
   0xe   : > { %p1759_p9 = por %p94_p8, %p93_p6 }
   0xf   : > { %s1757_s21 = scalar_select %p47_p7, %s1676_s11, %s49_s18  }
  0x10   : > { %138 = sbr.rel (%p1505_p10) target bundleno = 41 (0x29), region = 16 }
  0x15   : > { %141 = sbr.rel (!%p58_p4) target bundleno = 41 (0x29), region = 20  ;;  %s143_s23 = sand.u32 (%p58_p4), 1, %s1676_s11  }
  0x16   : > { %s1519_s24 = sshll.u32 (%p58_p4), %s1684_s13, 7  ;;  %s1506_s25 = sshll.u32 (%p58_p4), %s143_s23, 8 }
  0x17   : > { %s1771_s28 = scalar_lea.vmem (%p58_p4), %s2497_s0, %s1519_s24  ;;  %s1776_s29 = scalar_lea.vmem (%p58_p4), [#allocation4], %s1506_s25 }
  0x18   : > { %v243_v0 = vld [vmem:[%s1771_s28] sm:$0xff] (%p58_p4)  ;;  %v245_v1 = vld [vmem:[%s1771_s28 + $0x8] sm:$0xff] (%p58_p4)  ;;  %v247_v2 = vld [vmem:[%s1771_s28 + $0x10] sm:$0xff] (%p58_p4) }
  0x19   : > { %244 = vst [vmem:[%s1776_s29] sm:$0xff] (%p58_p4), %v243_v0  ;;  %246 = vst [vmem:[%s1776_s29 + $0x8] sm:$0xff] (%p58_p4), %v245_v1  ;;  %v249_v3 = vld [vmem:[%s1771_s28 + $0x18] sm:$0xff] (%p58_p4)  ;;  %v251_v4 = vld [vmem:[%s1771_s28 + $0x20] sm:$0xff] (%p58_p4) }
  0x1a   : > { %248 = vst [vmem:[%s1776_s29 + $0x10] sm:$0xff] %v247_v2  ;;  %v253_v5 = vld [vmem:[%s1771_s28 + $0x28] sm:$0xff]  ;;  %250 = vst [vmem:[%s1776_s29 + $0x18] sm:$0xff] %v249_v3  ;;  %v255_v6 = vld [vmem:[%s1771_s28 + $0x30] sm:$0xff] }
  0x1b   : > { %252 = vst [vmem:[%s1776_s29 + $0x20] sm:$0xff] %v251_v4  ;;  %254 = vst [vmem:[%s1776_s29 + $0x28] sm:$0xff] %v253_v5  ;;  %v257_v7 = vld [vmem:[%s1771_s28 + $0x38] sm:$0xff]  ;;  %v259_v8 = vld [vmem:[%s1771_s28 + $0x40] sm:$0xff] }
  0x1c   : > { %256 = vst [vmem:[%s1776_s29 + $0x30] sm:$0xff] %v255_v6  ;;  %258 = vst [vmem:[%s1776_s29 + $0x38] sm:$0xff] %v257_v7  ;;  %v261_v9 = vld [vmem:[%s1771_s28 + $0x48] sm:$0xff]  ;;  %v263_v10 = vld [vmem:[%s1771_s28 + $0x50] sm:$0xff] }
  0x1d   : > { %260 = vst [vmem:[%s1776_s29 + $0x40] sm:$0xff] %v259_v8  ;;  %v265_v11 = vld [vmem:[%s1771_s28 + $0x58] sm:$0xff]  ;;  %262 = vst [vmem:[%s1776_s29 + $0x48] sm:$0xff] %v261_v9  ;;  %v267_v12 = vld [vmem:[%s1771_s28 + $0x60] sm:$0xff] }
  0x1e   : > { %264 = vst [vmem:[%s1776_s29 + $0x50] sm:$0xff] %v263_v10  ;;  %266 = vst [vmem:[%s1776_s29 + $0x58] sm:$0xff] %v265_v11  ;;  %v269_v13 = vld [vmem:[%s1771_s28 + $0x68] sm:$0xff]  ;;  %v271_v14 = vld [vmem:[%s1771_s28 + $0x70] sm:$0xff] }
  0x1f   : > { %268 = vst [vmem:[%s1776_s29 + $0x60] sm:$0xff] %v267_v12  ;;  %270 = vst [vmem:[%s1776_s29 + $0x68] sm:$0xff] %v269_v13  ;;  %v273_v15 = vld [vmem:[%s1771_s28 + $0x78] sm:$0xff]  ;;  %v275_v16 = vld [vmem:[%s1771_s28 + $0x100] sm:$0xff] }
  0x20   : > { %272 = vst [vmem:[%s1776_s29 + $0x70] sm:$0xff] %v271_v14  ;;  %v277_v17 = vld [vmem:[%s1771_s28 + $0x108] sm:$0xff]  ;;  %274 = vst [vmem:[%s1776_s29 + $0x78] sm:$0xff] %v273_v15  ;;  %v279_v18 = vld [vmem:[%s1771_s28 + $0x110] sm:$0xff] }
  0x21   : > { %276 = vst [vmem:[%s1776_s29 + $0x80] sm:$0xff] %v275_v16  ;;  %278 = vst [vmem:[%s1776_s29 + $0x88] sm:$0xff] %v277_v17  ;;  %v281_v19 = vld [vmem:[%s1771_s28 + $0x118] sm:$0xff]  ;;  %v283_v20 = vld [vmem:[%s1771_s28 + $0x120] sm:$0xff] }
  0x22   : > { %280 = vst [vmem:[%s1776_s29 + $0x90] sm:$0xff] %v279_v18  ;;  %282 = vst [vmem:[%s1776_s29 + $0x98] sm:$0xff] %v281_v19  ;;  %v285_v21 = vld [vmem:[%s1771_s28 + $0x128] sm:$0xff]  ;;  %v287_v22 = vld [vmem:[%s1771_s28 + $0x130] sm:$0xff] }
  0x23   : > { %284 = vst [vmem:[%s1776_s29 + $0xa0] sm:$0xff] %v283_v20  ;;  %v289_v23 = vld [vmem:[%s1771_s28 + $0x138] sm:$0xff]  ;;  %286 = vst [vmem:[%s1776_s29 + $0xa8] sm:$0xff] %v285_v21  ;;  %v291_v24 = vld [vmem:[%s1771_s28 + $0x140] sm:$0xff] }
  0x24   : > { %288 = vst [vmem:[%s1776_s29 + $0xb0] sm:$0xff] %v287_v22  ;;  %290 = vst [vmem:[%s1776_s29 + $0xb8] sm:$0xff] %v289_v23  ;;  %v293_v25 = vld [vmem:[%s1771_s28 + $0x148] sm:$0xff]  ;;  %v295_v26 = vld [vmem:[%s1771_s28 + $0x150] sm:$0xff] }
  0x25   : > { %292 = vst [vmem:[%s1776_s29 + $0xc0] sm:$0xff] %v291_v24  ;;  %294 = vst [vmem:[%s1776_s29 + $0xc8] sm:$0xff] %v293_v25  ;;  %v297_v27 = vld [vmem:[%s1771_s28 + $0x158] sm:$0xff]  ;;  %v299_v28 = vld [vmem:[%s1771_s28 + $0x160] sm:$0xff] }
  0x26   : > { %296 = vst [vmem:[%s1776_s29 + $0xd0] sm:$0xff] %v295_v26  ;;  %v301_v29 = vld [vmem:[%s1771_s28 + $0x168] sm:$0xff]  ;;  %298 = vst [vmem:[%s1776_s29 + $0xd8] sm:$0xff] %v297_v27  ;;  %v303_v30 = vld [vmem:[%s1771_s28 + $0x170] sm:$0xff] }
  0x27   : > { %300 = vst [vmem:[%s1776_s29 + $0xe0] sm:$0xff] %v299_v28  ;;  %302 = vst [vmem:[%s1776_s29 + $0xe8] sm:$0xff] %v301_v29  ;;  %v305_v31 = vld [vmem:[%s1771_s28 + $0x178] sm:$0xff] }
  0x28   : > { %304 = vst [vmem:[%s1776_s29 + $0xf0] sm:$0xff] %v303_v30  ;;  %306 = vst [vmem:[%s1776_s29 + $0xf8] sm:$0xff] %v305_v31 }
  0x29 PF: > { %p1509_p11 = scmp.ge.s32.totalorder %s1688_s14, 1  ;;  %p311_p12 = scmp.lt.s32.totalorder %s1688_s14, 3 }
  0x2b   : > { %p312_p13 = pnand %p1509_p11, %p311_p12 }
  0x2c   : > { %s1842_s30 = sand.u32 (!%p312_p13), 1, %s1672_s10   ;;  %s1515_s6 = sshll.u32 (!%p312_p13), %s1680_s12, 5 }
  0x2d   : > { %315 = sbr.rel (%p312_p13) target bundleno = 385 (0x181), region = 58  ;;  %s1510_s3 = sshll.u32 (!%p312_p13), %s1842_s30, 8 }
  0x2e   : > { %s1911_s4 = scalar_lea.vmem (!%p312_p13), [#allocation4], %s1510_s3  ;;  %s1511_s5 = sshll.u32 (!%p312_p13), %s1842_s30, 1 }
  0x2f   : > { %s336_s7 = scalar_lea.vmem (!%p312_p13), [#allocation5], %s1511_s5  ;;  %s2381_s18 = scalar_lea.hbm (!%p312_p13), %s2498_s1, %s1515_s6 }
  0x30   : > { %s1371_s8 = sshll.u32 (!%p312_p13), %s336_s7, 4  ;;  %s1351_s20 = scalar_lea.sflag (!%p312_p13), [#allocation6], %s1842_s30  ;;  %s2383_s8 = int_to_ptr.vmem [resolvable:$true] %s1371_s8 }
  0x31   : > { %s1582_s23 = scalar_lea.vmem (!%p312_p13), %s2383_s8, 32  ;;  %s1692_s24 = smov (!%p312_p13), [#allocation5]  }
  0x32   : > { %vm350_vm0 = vcmask 523264   ;;  %v1690_v32 = vmov 0.0   ;;  %v1691_v33 = vmov -inf   ;;  %v1914_v34 = vld [vmem:[%s1911_s4 + $0x10] sm:$0xff]  ;;  %v1917_v35 = vld [vmem:[%s1911_s4] sm:$0xff]  ;;  %v1920_v36 = vld [vmem:[%s1911_s4 + $0x18] sm:$0xff]  ;;  %p1583_p0 = scmp.ne.s32.totalorder %s2383_s8, %s1582_s23 }
  0x33   : > { %353 = vst.msk [vmem:[#allocation2 + $0x10] sm:$0xff] %vm350_vm0, %v1690_v32  ;;  %351 = vst.msk [vmem:[#allocation2] sm:$0xff] %vm350_vm0, %v1690_v32  ;;  %v1923_v37 = vld [vmem:[%s1911_s4 + $0x8] sm:$0xff]  ;;  %v1929_v39 = vld [vmem:[%s1911_s4 + $0x20] sm:$0xff]  ;;  %vm846_vm1 = vcmask 130112   ;;  %vm853_vm2 = vcmask 195712  }
  0x34   : > { %352 = vst.msk [vmem:[#allocation2 + $0x8] sm:$0xff] %vm350_vm0, %v1690_v32  ;;  %354 = vst.msk [vmem:[#allocation2 + $0x18] sm:$0xff] %vm350_vm0, %v1690_v32  ;;  %v1926_v38 = vld [vmem:[%s1911_s4 + $0x28] sm:$0xff]  ;;  %v1932_v40 = vld [vmem:[%s1911_s4 + $0x38] sm:$0xff]  ;;  %vm860_vm3 = vcmask 261312   ;;  %vm867_vm4 = vcmask 326912   ;;  %p1584_p1 = pnand %p1583_p0, %p1748_p5 }
  0x35   : > { %355 = vst.msk [vmem:[#allocation2 + $0x20] sm:$0xff] %vm350_vm0, %v1690_v32  ;;  %356 = vst.msk [vmem:[#allocation2 + $0x28] sm:$0xff] %vm350_vm0, %v1690_v32  ;;  %v1935_v41 = vld [vmem:[%s1911_s4 + $0x30] sm:$0xff]  ;;  %v1938_v42 = vld [vmem:[%s1911_s4 + $0x48] sm:$0xff]  ;;  %vm874_vm5 = vcmask 392512   ;;  %vm881_vm6 = vcmask 458112  }
  0x36   : > { %357 = vst.msk [vmem:[#allocation2 + $0x30] sm:$0xff] %vm350_vm0, %v1690_v32  ;;  %358 = vst.msk [vmem:[#allocation2 + $0x38] sm:$0xff] %vm350_vm0, %v1690_v32  ;;  %v1941_v43 = vld [vmem:[%s1911_s4 + $0x40] sm:$0xff]  ;;  %v1944_v44 = vld [vmem:[%s1911_s4 + $0x58] sm:$0xff]  ;;  %vm888_vm7 = vcmask 523712   ;;  %vm895_vm8 = vcmask 589312   ;;  %p1585_p2 = pneg %p1584_p1 }
  0x37   : > { %359 = vst.msk [vmem:[#allocation2 + $0x40] sm:$0xff] %vm350_vm0, %v1690_v32  ;;  %360 = vst.msk [vmem:[#allocation2 + $0x48] sm:$0xff] %vm350_vm0, %v1690_v32  ;;  %v1947_v45 = vld [vmem:[%s1911_s4 + $0x50] sm:$0xff]  ;;  %v1950_v49 = vld [vmem:[%s1911_s4 + $0x68] sm:$0xff]  ;;  %vm902_vm9 = vcmask 654912   ;;  %vm909_vm10 = vcmask 720512  }
  0x38   : > { %361 = vst.msk [vmem:[#allocation2 + $0x50] sm:$0xff] %vm350_vm0, %v1690_v32  ;;  %362 = vst.msk [vmem:[#allocation2 + $0x58] sm:$0xff] %vm350_vm0, %v1690_v32  ;;  %v1953_v50 = vld [vmem:[%s1911_s4 + $0x60] sm:$0xff]  ;;  %v1956_v51 = vld [vmem:[%s1911_s4 + $0x78] sm:$0xff]  ;;  %vm916_vm11 = vcmask 786112   ;;  %vm923_vm12 = vcmask 851712  }
  0x39   : > { %363 = vst.msk [vmem:[#allocation2 + $0x60] sm:$0xff] %vm350_vm0, %v1690_v32  ;;  %364 = vst.msk [vmem:[#allocation2 + $0x68] sm:$0xff] %vm350_vm0, %v1690_v32  ;;  %v1983_v15 = vld [vmem:[%s1911_s4 + $0x70] sm:$0xff]  ;;  %v432_v17 = vld [vmem:[%s1911_s4 + $0x88] sm:$0xff]  ;;  %vm930_vm13 = vcmask 917312   ;;  %vm937_vm14 = vcmask 982912  }
  0x3a   : > { %365 = vst.msk [vmem:[#allocation2 + $0x70] sm:$0xff] %vm350_vm0, %v1690_v32  ;;  %366 = vst.msk [vmem:[#allocation2 + $0x78] sm:$0xff] %vm350_vm0, %v1690_v32  ;;  %v449_v46 = vld [vmem:[#allocation2 + $0x10] sm:$0xff]  ;;  %v447_v47 = vld [vmem:[#allocation2] sm:$0xff]  ;;  %vm944_vm15 = vcmask 1048512   ;;  %s1586_s25 = sshll.u32 %s1692_s24, 4  ;;  %s1587_s25 = int_to_ptr.vmem [resolvable:$false] %s1586_s25 }
  0x3b   : > { %367 = vst.msk [vmem:[#allocation2 + $0x80] sm:$0xff] %vm350_vm0, %v1690_v32  ;;  %368 = vst.msk [vmem:[#allocation2 + $0x88] sm:$0xff] %vm350_vm0, %v1690_v32  ;;  %v450_v48 = vld [vmem:[#allocation2 + $0x18] sm:$0xff]  ;;  %v481_v52 = vadd.f32 %v449_v46, %v1914_v34  ;;  %v479_v53 = vadd.f32 %v447_v47, %v1917_v35  ;;  %v448_v55 = vld [vmem:[#allocation2 + $0x8] sm:$0xff]  ;;  %s1588_s26 = scalar_lea.vmem %s1587_s25, 64  ;;  %p1589_p3 = scmp.lt.s32.totalorder %s2383_s8, %s1587_s25 }
  0x3c   : > { %369 = vst.msk [vmem:[#allocation2 + $0x90] sm:$0xff] %vm350_vm0, %v1690_v32  ;;  %370 = vst.msk [vmem:[#allocation2 + $0x98] sm:$0xff] %vm350_vm0, %v1690_v32  ;;  %v482_v54 = vadd.f32 %v450_v48, %v1920_v36  ;;  %v452_v56 = vld [vmem:[#allocation2 + $0x28] sm:$0xff]  ;;  %v451_v57 = vld [vmem:[#allocation2 + $0x20] sm:$0xff]  ;;  %v480_v58 = vadd.f32 %v448_v55, %v1923_v37  ;;  %p1590_p4 = scmp.lt.s32.totalorder %s1588_s26, %s1582_s23 }
  0x3d   : > { %371 = vst.msk [vmem:[#allocation2 + $0xa0] sm:$0xff] %vm350_vm0, %v1690_v32  ;;  %372 = vst.msk [vmem:[#allocation2 + $0xa8] sm:$0xff] %vm350_vm0, %v1690_v32  ;;  %v484_v59 = vadd.f32 %v452_v56, %v1926_v38  ;;  %v483_v60 = vadd.f32 %v451_v57, %v1929_v39  ;;  %v454_v61 = vld [vmem:[#allocation2 + $0x38] sm:$0xff]  ;;  %v453_v62 = vld [vmem:[#allocation2 + $0x30] sm:$0xff] }
  0x3e   : > { %373 = vst.msk [vmem:[#allocation2 + $0xb0] sm:$0xff] %vm350_vm0, %v1690_v32  ;;  %374 = vst.msk [vmem:[#allocation2 + $0xb8] sm:$0xff] %vm350_vm0, %v1690_v32  ;;  %v456_v63 = vld [vmem:[#allocation2 + $0x48] sm:$0xff]  ;;  %v486_v0 = vadd.f32 %v454_v61, %v1932_v40  ;;  %v485_v1 = vadd.f32 %v453_v62, %v1935_v41  ;;  %v455_v3 = vld [vmem:[#allocation2 + $0x40] sm:$0xff]  ;;  %p1591_p6 = por %p1590_p4, %p1589_p3 }
  0x3f   : > { %375 = vst.msk [vmem:[#allocation2 + $0xc0] sm:$0xff] %vm350_vm0, %v1690_v32  ;;  %376 = vst.msk [vmem:[#allocation2 + $0xc8] sm:$0xff] %vm350_vm0, %v1690_v32  ;;  %v488_v2 = vadd.f32 %v456_v63, %v1938_v42  ;;  %v458_v4 = vld [vmem:[#allocation2 + $0x58] sm:$0xff]  ;;  %v457_v5 = vld [vmem:[#allocation2 + $0x50] sm:$0xff]  ;;  %v487_v6 = vadd.f32 %v455_v3, %v1941_v43 }
  0x40   : > { %377 = vst.msk [vmem:[#allocation2 + $0xd0] sm:$0xff] %vm350_vm0, %v1690_v32  ;;  %378 = vst.msk [vmem:[#allocation2 + $0xd8] sm:$0xff] %vm350_vm0, %v1690_v32  ;;  %v490_v7 = vadd.f32 %v458_v4, %v1944_v44  ;;  %v489_v8 = vadd.f32 %v457_v5, %v1947_v45  ;;  %v460_v9 = vld [vmem:[#allocation2 + $0x68] sm:$0xff]  ;;  %v459_v10 = vld [vmem:[#allocation2 + $0x60] sm:$0xff]  ;;  %p1592_p7 = pnand %p1591_p6, %p1585_p2 }
  0x41   : > { %379 = vst.msk [vmem:[#allocation2 + $0xe0] sm:$0xff] %vm350_vm0, %v1690_v32  ;;  %380 = vst.msk [vmem:[#allocation2 + $0xe8] sm:$0xff] %vm350_vm0, %v1690_v32  ;;  %v462_v11 = vld [vmem:[#allocation2 + $0x78] sm:$0xff]  ;;  %v492_v12 = vadd.f32 %v460_v9, %v1950_v49  ;;  %v491_v13 = vadd.f32 %v459_v10, %v1953_v50  ;;  %v461_v16 = vld [vmem:[#allocation2 + $0x70] sm:$0xff] }
  0x42   : > { %381 = vst.msk [vmem:[#allocation2 + $0xf0] sm:$0xff] %vm350_vm0, %v1690_v32  ;;  %382 = vst.msk [vmem:[#allocation2 + $0xf8] sm:$0xff] %vm350_vm0, %v1690_v32  ;;  %v494_v14 = vadd.f32 %v462_v11, %v1956_v51  ;;  %v493_v18 = vadd.f32 %v461_v16, %v1983_v15  ;;  %v464_v19 = vld [vmem:[#allocation2 + $0x88] sm:$0xff]  ;;  %v431_v20 = vld [vmem:[%s1911_s4 + $0x80] sm:$0xff] }
  0x43   : > { %384 = vst.msk [vmem:[#allocation3 + $0x8] sm:$0xff] %vm350_vm0, %v1691_v33  ;;  %383 = vst.msk [vmem:[#allocation3] sm:$0xff] %vm350_vm0, %v1691_v33  ;;  %v463_v21 = vld [vmem:[#allocation2 + $0x80] sm:$0xff]  ;;  %v496_v22 = vadd.f32 %v464_v19, %v432_v17  ;;  %v1995_v24 = vld [vmem:[%s1911_s4 + $0x98] sm:$0xff] }
  0x44   : > { %385 = vst.msk [vmem:[#allocation3 + $0x10] sm:$0xff] %vm350_vm0, %v1691_v33  ;;  %386 = vst.msk [vmem:[#allocation3 + $0x18] sm:$0xff] %vm350_vm0, %v1691_v33  ;;  %v495_v23 = vadd.f32 %v463_v21, %v431_v20  ;;  %v466_v25 = vld [vmem:[#allocation2 + $0x98] sm:$0xff]  ;;  %v433_v26 = vld [vmem:[%s1911_s4 + $0x90] sm:$0xff] }
  0x45   : > { %387 = vst.msk [vmem:[#allocation3 + $0x20] sm:$0xff] %vm350_vm0, %v1691_v33  ;;  %388 = vst.msk [vmem:[#allocation3 + $0x28] sm:$0xff] %vm350_vm0, %v1691_v33  ;;  %v498_v27 = vadd.f32 %v466_v25, %v1995_v24  ;;  %v465_v28 = vld [vmem:[#allocation2 + $0x90] sm:$0xff]  ;;  %v435_v62 = vld [vmem:[%s1911_s4 + $0xa0] sm:$0xff] }
  0x46   : > { %389 = vst.msk [vmem:[#allocation3 + $0x30] sm:$0xff] %vm350_vm0, %v1691_v33  ;;  %390 = vst.msk [vmem:[#allocation3 + $0x38] sm:$0xff] %vm350_vm0, %v1691_v33  ;;  %v497_v31 = vadd.f32 %v465_v28, %v433_v26  ;;  %v467_v63 = vld [vmem:[#allocation2 + $0xa0] sm:$0xff]  ;;  %v468_v5 = vld [vmem:[#allocation2 + $0xa8] sm:$0xff] }
  0x47   : > { %391 = vst.msk [vmem:[#allocation3 + $0x40] sm:$0xff] %vm350_vm0, %v1691_v33  ;;  %392 = vst.msk [vmem:[#allocation3 + $0x48] sm:$0xff] %vm350_vm0, %v1691_v33  ;;  %v437_v21 = vld [vmem:[%s1911_s4 + $0xb0] sm:$0xff] }
  0x48   : > { %393 = vst.msk [vmem:[#allocation3 + $0x50] sm:$0xff] %vm350_vm0, %v1691_v33  ;;  %394 = vst.msk [vmem:[#allocation3 + $0x58] sm:$0xff] %vm350_vm0, %v1691_v33 }
  0x49   : > { %395 = vst.msk [vmem:[#allocation3 + $0x60] sm:$0xff] %vm350_vm0, %v1691_v33  ;;  %396 = vst.msk [vmem:[#allocation3 + $0x68] sm:$0xff] %vm350_vm0, %v1691_v33 }
  0x4a   : > { %397 = vst.msk [vmem:[#allocation3 + $0x70] sm:$0xff] %vm350_vm0, %v1691_v33  ;;  %398 = vst.msk [vmem:[#allocation3 + $0x78] sm:$0xff] %vm350_vm0, %v1691_v33  ;;  %v545_v29 = vld [vmem:[#allocation3 + $0x8] sm:$0xff]  ;;  %v544_v30 = vld [vmem:[#allocation3] sm:$0xff] }
  0x4b   : > { %399 = vst.msk [vmem:[#allocation3 + $0x80] sm:$0xff] %vm350_vm0, %v1691_v33  ;;  %400 = vst.msk [vmem:[#allocation3 + $0x88] sm:$0xff] %vm350_vm0, %v1691_v33  ;;  %v577_v32 = vmax.f32 %v545_v29, %v1923_v37  ;;  %v546_v48 = vld [vmem:[#allocation3 + $0x10] sm:$0xff] }
  0x4c   : > { %401 = vst.msk [vmem:[#allocation3 + $0x90] sm:$0xff] %vm350_vm0, %v1691_v33  ;;  %402 = vst.msk [vmem:[#allocation3 + $0x98] sm:$0xff] %vm350_vm0, %v1691_v33  ;;  %v578_v57 = vmax.f32 %v546_v48, %v1914_v34  ;;  %v548_v16 = vld [vmem:[#allocation3 + $0x20] sm:$0xff]  ;;  %v440_v48 = vld [vmem:[%s1911_s4 + $0xc8] sm:$0xff] }
  0x4d   : > { %403 = vst.msk [vmem:[#allocation3 + $0xa0] sm:$0xff] %vm350_vm0, %v1691_v33  ;;  %404 = vst.msk [vmem:[#allocation3 + $0xa8] sm:$0xff] %vm350_vm0, %v1691_v33 }
  0x4e   : > { %405 = vst.msk [vmem:[#allocation3 + $0xb0] sm:$0xff] %vm350_vm0, %v1691_v33  ;;  %406 = vst.msk [vmem:[#allocation3 + $0xb8] sm:$0xff] %vm350_vm0, %v1691_v33 }
  0x4f   : > { %407 = vst.msk [vmem:[#allocation3 + $0xc0] sm:$0xff] %vm350_vm0, %v1691_v33  ;;  %408 = vst.msk [vmem:[#allocation3 + $0xc8] sm:$0xff] %vm350_vm0, %v1691_v33 }
  0x50   : > { %409 = vst.msk [vmem:[#allocation3 + $0xd0] sm:$0xff] %vm350_vm0, %v1691_v33  ;;  %410 = vst.msk [vmem:[#allocation3 + $0xd8] sm:$0xff] %vm350_vm0, %v1691_v33 }
  0x51   : > { %411 = vst.msk [vmem:[#allocation3 + $0xe0] sm:$0xff] %vm350_vm0, %v1691_v33  ;;  %412 = vst.msk [vmem:[#allocation3 + $0xe8] sm:$0xff] %vm350_vm0, %v1691_v33 }
  0x52   : > { %413 = vst.msk [vmem:[#allocation3 + $0xf0] sm:$0xff] %vm350_vm0, %v1691_v33  ;;  %414 = vst.msk [vmem:[#allocation3 + $0xf8] sm:$0xff] %vm350_vm0, %v1691_v33  ;;  %v576_v33 = vmax.f32 %v544_v30, %v1917_v35  ;;  %v561_v46 = vld [vmem:[#allocation3 + $0x88] sm:$0xff]  ;;  %v560_v47 = vld [vmem:[#allocation3 + $0x80] sm:$0xff] }
  0x53   : > { %514 = vst.msk [vmem:[#allocation2 + $0x10] sm:$0xff] %vm350_vm0, %v481_v52  ;;  %512 = vst.msk [vmem:[#allocation2] sm:$0xff] %vm350_vm0, %v479_v53  ;;  %v593_v55 = vmax.f32 %v561_v46, %v432_v17  ;;  %v592_v56 = vmax.f32 %v560_v47, %v431_v20  ;;  %v580_v20 = vmax.f32 %v548_v16, %v1929_v39  ;;  %v549_v30 = vld [vmem:[#allocation3 + $0x28] sm:$0xff]  ;;  %v550_v39 = vld [vmem:[#allocation3 + $0x30] sm:$0xff] }
  0x54   : > { %515 = vst.msk [vmem:[#allocation2 + $0x18] sm:$0xff] %vm350_vm0, %v482_v54  ;;  %513 = vst.msk [vmem:[#allocation2 + $0x8] sm:$0xff] %vm350_vm0, %v480_v58  ;;  %v565_v28 = vld [vmem:[#allocation3 + $0xa8] sm:$0xff]  ;;  %v582_v46 = vmax.f32 %v550_v39, %v1935_v41  ;;  %v471_v47 = vld [vmem:[#allocation2 + $0xc0] sm:$0xff] }
  0x55   : > { %517 = vst.msk [vmem:[#allocation2 + $0x28] sm:$0xff] %vm350_vm0, %v484_v59  ;;  %516 = vst.msk [vmem:[#allocation2 + $0x20] sm:$0xff] %vm350_vm0, %v483_v60 }
  0x56   : > { %519 = vst.msk [vmem:[#allocation2 + $0x38] sm:$0xff] %vm350_vm0, %v486_v0  ;;  %518 = vst.msk [vmem:[#allocation2 + $0x30] sm:$0xff] %vm350_vm0, %v485_v1  ;;  %v499_v0 = vadd.f32 %v467_v63, %v435_v62  ;;  %v436_v1 = vld [vmem:[%s1911_s4 + $0xa8] sm:$0xff] }
  0x57   : > { %521 = vst.msk [vmem:[#allocation2 + $0x48] sm:$0xff] %vm350_vm0, %v488_v2  ;;  %520 = vst.msk [vmem:[#allocation2 + $0x40] sm:$0xff] %vm350_vm0, %v487_v6  ;;  %v562_v6 = vld [vmem:[#allocation3 + $0x90] sm:$0xff] }
  0x58   : > { %523 = vst.msk [vmem:[#allocation2 + $0x58] sm:$0xff] %vm350_vm0, %v490_v7  ;;  %522 = vst.msk [vmem:[#allocation2 + $0x50] sm:$0xff] %vm350_vm0, %v489_v8  ;;  %v500_v8 = vadd.f32 %v468_v5, %v436_v1  ;;  %v594_v9 = vmax.f32 %v562_v6, %v433_v26  ;;  %v470_v26 = vld [vmem:[#allocation2 + $0xb8] sm:$0xff]  ;;  %v569_v5 = vld [vmem:[#allocation3 + $0xc8] sm:$0xff] }
  0x59   : > { %525 = vst.msk [vmem:[#allocation2 + $0x68] sm:$0xff] %vm350_vm0, %v492_v12  ;;  %524 = vst.msk [vmem:[#allocation2 + $0x60] sm:$0xff] %vm350_vm0, %v491_v13  ;;  %v563_v13 = vld [vmem:[#allocation3 + $0x98] sm:$0xff]  ;;  %v553_v6 = vld [vmem:[#allocation3 + $0x48] sm:$0xff] }
  0x5a   : > { %527 = vst.msk [vmem:[#allocation2 + $0x78] sm:$0xff] %vm350_vm0, %v494_v14  ;;  %526 = vst.msk [vmem:[#allocation2 + $0x70] sm:$0xff] %vm350_vm0, %v493_v18  ;;  %v645_v52 = vld [vmem:[#allocation2 + $0x10] sm:$0xff]  ;;  %v643_v53 = vld [vmem:[#allocation2] sm:$0xff]  ;;  %v595_v18 = vmax.f32 %v563_v13, %v1995_v24 }
  0x5b   : > { %529 = vst.msk [vmem:[#allocation2 + $0x88] sm:$0xff] %vm350_vm0, %v496_v22  ;;  %528 = vst.msk [vmem:[#allocation2 + $0x80] sm:$0xff] %vm350_vm0, %v495_v23  ;;  %v646_v54 = vld [vmem:[#allocation2 + $0x18] sm:$0xff]  ;;  %v681_v58 = vsel %vm350_vm0, %v645_v52, 0.0  ;;  %v675_v59 = vsel %vm350_vm0, %v643_v53, 0.0  ;;  %v644_v37 = vld [vmem:[#allocation2 + $0x8] sm:$0xff] }
  0x5c   : > { %531 = vst.msk [vmem:[#allocation2 + $0x98] sm:$0xff] %vm350_vm0, %v498_v27  ;;  %530 = vst.msk [vmem:[#allocation2 + $0x90] sm:$0xff] %vm350_vm0, %v497_v31  ;;  %682 = vadd.xlane.f32.xlu1 %v681_v58  ;;  %676 = vadd.xlane.f32.xlu0 %v675_v59  ;;  %v684_v34 = vsel %vm350_vm0, %v646_v54, 0.0  ;;  %v678_v35 = vsel %vm350_vm0, %v644_v37, 0.0  ;;  %v648_v60 = vld [vmem:[#allocation2 + $0x28] sm:$0xff]  ;;  %v647_v61 = vld [vmem:[#allocation2 + $0x20] sm:$0xff] }
  0x5d   : > { %609 = vst.msk [vmem:[#allocation3 + $0x8] sm:$0xff] %vm350_vm0, %v577_v32  ;;  %608 = vst.msk [vmem:[#allocation3] sm:$0xff] %vm350_vm0, %v576_v33  ;;  %v690_v2 = vsel %vm350_vm0, %v648_v60, 0.0  ;;  %v687_v3 = vsel %vm350_vm0, %v647_v61, 0.0  ;;  %v650_v4 = vld [vmem:[#allocation2 + $0x38] sm:$0xff]  ;;  %v649_v7 = vld [vmem:[#allocation2 + $0x30] sm:$0xff]  ;;  %v581_v33 = vmax.f32 %v549_v30, %v1926_v38 }
  0x5e   : > { %625 = vst.msk [vmem:[#allocation3 + $0x88] sm:$0xff] %vm350_vm0, %v593_v55  ;;  %624 = vst.msk [vmem:[#allocation3 + $0x80] sm:$0xff] %vm350_vm0, %v592_v56  ;;  %v696_v10 = vsel %vm350_vm0, %v650_v4, 0.0  ;;  %v652_v11 = vld [vmem:[#allocation2 + $0x48] sm:$0xff]  ;;  %v651_v12 = vld [vmem:[#allocation2 + $0x40] sm:$0xff]  ;;  %v693_v17 = vsel %vm350_vm0, %v649_v7, 0.0 }
  0x5f   : > { %610 = vst.msk [vmem:[#allocation3 + $0x10] sm:$0xff] %vm350_vm0, %v578_v57  ;;  %532 = vst.msk [vmem:[#allocation2 + $0xa0] sm:$0xff] %vm350_vm0, %v499_v0  ;;  %v547_v14 = vld [vmem:[#allocation3 + $0x18] sm:$0xff]  ;;  %v469_v22 = vld [vmem:[#allocation2 + $0xb0] sm:$0xff]  ;;  %v702_v53 = vsel %vm350_vm0, %v652_v11, 0.0  ;;  %v699_v54 = vsel %vm350_vm0, %v651_v12, 0.0  ;;  %v585_v11 = vmax.f32 %v553_v6, %v1938_v42 }
  0x60   : > { %685 = vadd.xlane.f32.xlu1 %v684_v34  ;;  %679 = vadd.xlane.f32.xlu0 %v678_v35  ;;  %533 = vst.msk [vmem:[#allocation2 + $0xa8] sm:$0xff] %vm350_vm0, %v500_v8  ;;  %626 = vst.msk [vmem:[#allocation3 + $0x90] sm:$0xff] %vm350_vm0, %v594_v9  ;;  %v579_v19 = vmax.f32 %v547_v14, %v1920_v36  ;;  %v438_v23 = vld [vmem:[%s1911_s4 + $0xb8] sm:$0xff]  ;;  %v501_v25 = vadd.f32 %v469_v22, %v437_v21  ;;  %v564_v27 = vld [vmem:[#allocation3 + $0xa0] sm:$0xff] }
  0x61   : > { %627 = vst.msk [vmem:[#allocation3 + $0x98] sm:$0xff] %vm350_vm0, %v595_v18  ;;  %612 = vst.msk [vmem:[#allocation3 + $0x20] sm:$0xff] %vm350_vm0, %v580_v20  ;;  %v502_v24 = vadd.f32 %v470_v26, %v438_v23  ;;  %v596_v29 = vmax.f32 %v564_v27, %v435_v62  ;;  %v597_v36 = vmax.f32 %v565_v28, %v436_v1  ;;  %v439_v31 = vld [vmem:[%s1911_s4 + $0xc0] sm:$0xff]  ;;  %v654_v32 = vld [vmem:[#allocation2 + $0x58] sm:$0xff] }
  0x62   : > { %611 = vst.msk [vmem:[#allocation3 + $0x18] sm:$0xff] %vm350_vm0, %v579_v19  ;;  %534 = vst.msk [vmem:[#allocation2 + $0xb0] sm:$0xff] %vm350_vm0, %v501_v25  ;;  %v472_v52 = vld [vmem:[#allocation2 + $0xc8] sm:$0xff]  ;;  %v653_v55 = vld [vmem:[#allocation2 + $0x50] sm:$0xff]  ;;  %v503_v56 = vadd.f32 %v471_v47, %v439_v31 }
  0x63   : > { %535 = vst.msk [vmem:[#allocation2 + $0xb8] sm:$0xff] %vm350_vm0, %v502_v24  ;;  %628 = vst.msk [vmem:[#allocation3 + $0xa0] sm:$0xff] %vm350_vm0, %v596_v29  ;;  %v504_v57 = vadd.f32 %v472_v52, %v440_v48  ;;  %v566_v38 = vld [vmem:[#allocation3 + $0xb0] sm:$0xff]  ;;  %v567_v58 = vld [vmem:[#allocation3 + $0xb8] sm:$0xff]  ;;  %v705_v4 = vsel %vm350_vm0, %v653_v55, 0.0 }
  0x64   : > { %691 = vadd.xlane.f32.xlu1 %v690_v2  ;;  %688 = vadd.xlane.f32.xlu0 %v687_v3  ;;  %629 = vst.msk [vmem:[#allocation3 + $0xa8] sm:$0xff] %vm350_vm0, %v597_v36  ;;  %613 = vst.msk [vmem:[#allocation3 + $0x28] sm:$0xff] %vm350_vm0, %v581_v33  ;;  %v598_v41 = vmax.f32 %v566_v38, %v437_v21  ;;  %v599_v59 = vmax.f32 %v567_v58, %v438_v23  ;;  %v551_v37 = vld [vmem:[#allocation3 + $0x38] sm:$0xff]  ;;  %v552_v34 = vld [vmem:[#allocation3 + $0x40] sm:$0xff]  ;;  %v708_v3 = vsel %vm350_vm0, %v654_v32, 0.0 }
  0x65   : > { %614 = vst.msk [vmem:[#allocation3 + $0x30] sm:$0xff] %vm350_vm0, %v582_v46  ;;  %v441_v35 = vld [vmem:[%s1911_s4 + $0xd0] sm:$0xff]  ;;  %536 = vst.msk [vmem:[#allocation2 + $0xc0] sm:$0xff] %vm350_vm0, %v503_v56  ;;  %v583_v60 = vmax.f32 %v551_v37, %v1932_v40  ;;  %v584_v61 = vmax.f32 %v552_v34, %v1941_v43  ;;  %v442_v0 = vld [vmem:[%s1911_s4 + $0xd8] sm:$0xff] }
  0x66   : > { %537 = vst.msk [vmem:[#allocation2 + $0xc8] sm:$0xff] %vm350_vm0, %v504_v57  ;;  %v473_v62 = vld [vmem:[#allocation2 + $0xd0] sm:$0xff]  ;;  %630 = vst.msk [vmem:[#allocation3 + $0xb0] sm:$0xff] %vm350_vm0, %v598_v41  ;;  %v474_v1 = vld [vmem:[#allocation2 + $0xd8] sm:$0xff] }
  0x67   : > { %631 = vst.msk [vmem:[#allocation3 + $0xb8] sm:$0xff] %vm350_vm0, %v599_v59  ;;  %v505_v63 = vadd.f32 %v473_v62, %v441_v35  ;;  %v568_v2 = vld [vmem:[#allocation3 + $0xc0] sm:$0xff]  ;;  %615 = vst.msk [vmem:[#allocation3 + $0x38] sm:$0xff] %vm350_vm0, %v583_v60  ;;  %v506_v40 = vadd.f32 %v474_v1, %v442_v0  ;;  %v554_v7 = vld [vmem:[#allocation3 + $0x50] sm:$0xff] }
  0x68   : > { %697 = vadd.xlane.f32.xlu1 %v696_v10  ;;  %694 = vadd.xlane.f32.xlu0 %v693_v17  ;;  %616 = vst.msk [vmem:[#allocation3 + $0x40] sm:$0xff] %vm350_vm0, %v584_v61  ;;  %v600_v43 = vmax.f32 %v568_v2, %v439_v31  ;;  %v656_v8 = vld [vmem:[#allocation2 + $0x68] sm:$0xff]  ;;  %v655_v9 = vld [vmem:[#allocation2 + $0x60] sm:$0xff]  ;;  %v601_v10 = vmax.f32 %v569_v5, %v440_v48  ;;  %617 = vst.msk [vmem:[#allocation3 + $0x48] sm:$0xff] %vm350_vm0, %v585_v11 }
  0x69   : > { %538 = vst.msk [vmem:[#allocation2 + $0xd0] sm:$0xff] %vm350_vm0, %v505_v63  ;;  %v586_v12 = vmax.f32 %v554_v7, %v1947_v45  ;;  %539 = vst.msk [vmem:[#allocation2 + $0xd8] sm:$0xff] %vm350_vm0, %v506_v40  ;;  %v2063_v13 = vld [vmem:[%s1911_s4 + $0xe0] sm:$0xff]  ;;  %v714_v42 = vsel %vm350_vm0, %v656_v8, 0.0  ;;  %v711_v45 = vsel %vm350_vm0, %v655_v9, 0.0  ;;  %v444_v17 = vld [vmem:[%s1911_s4 + $0xe8] sm:$0xff] }
  0x6a   : > { %632 = vst.msk [vmem:[#allocation3 + $0xc0] sm:$0xff] %vm350_vm0, %v600_v43  ;;  %v475_v14 = vld [vmem:[#allocation2 + $0xe0] sm:$0xff]  ;;  %633 = vst.msk [vmem:[#allocation3 + $0xc8] sm:$0xff] %vm350_vm0, %v601_v10  ;;  %v658_v18 = vld [vmem:[#allocation2 + $0x78] sm:$0xff] }
  0x6b   : > { %618 = vst.msk [vmem:[#allocation3 + $0x50] sm:$0xff] %vm350_vm0, %v586_v12  ;;  %v507_v16 = vadd.f32 %v475_v14, %v2063_v13  ;;  %v657_v19 = vld [vmem:[#allocation2 + $0x70] sm:$0xff]  ;;  %v476_v20 = vld [vmem:[#allocation2 + $0xe8] sm:$0xff]  ;;  %v571_v25 = vld [vmem:[#allocation3 + $0xd8] sm:$0xff]  ;;  %v720_v26 = vsel %vm350_vm0, %v658_v18, 0.0 }
  0x6c   : > { %703 = vadd.xlane.f32.xlu1 %v702_v53  ;;  %700 = vadd.xlane.f32.xlu0 %v699_v54  ;;  %v508_v21 = vadd.f32 %v476_v20, %v444_v17  ;;  %v570_v22 = vld [vmem:[#allocation3 + $0xd0] sm:$0xff]  ;;  %v717_v27 = vsel %vm350_vm0, %v657_v19, 0.0  ;;  %v603_v28 = vmax.f32 %v571_v25, %v442_v0  ;;  %v555_v24 = vld [vmem:[#allocation3 + $0x58] sm:$0xff]  ;;  %v556_v29 = vld [vmem:[#allocation3 + $0x60] sm:$0xff] }
  0x6d   : > { %540 = vst.msk [vmem:[#allocation2 + $0xe0] sm:$0xff] %vm350_vm0, %v507_v16  ;;  %v602_v23 = vmax.f32 %v570_v22, %v441_v35  ;;  %v660_v36 = vld [vmem:[#allocation2 + $0x88] sm:$0xff]  ;;  %v659_v30 = vld [vmem:[#allocation2 + $0x80] sm:$0xff]  ;;  %v587_v39 = vmax.f32 %v555_v24, %v1944_v44  ;;  %v588_v31 = vmax.f32 %v556_v29, %v1953_v50  ;;  %v445_v32 = vld [vmem:[%s1911_s4 + $0xf0] sm:$0xff] }
  0x6e   : > { %541 = vst.msk [vmem:[#allocation2 + $0xe8] sm:$0xff] %vm350_vm0, %v508_v21  ;;  %635 = vst.msk [vmem:[#allocation3 + $0xd8] sm:$0xff] %vm350_vm0, %v603_v28  ;;  %v662_v33 = vld [vmem:[#allocation2 + $0x98] sm:$0xff]  ;;  %v477_v46 = vld [vmem:[#allocation2 + $0xf0] sm:$0xff]  ;;  %v726_v52 = vsel %vm350_vm0, %v660_v36, 0.0  ;;  %v723_v53 = vsel %vm350_vm0, %v659_v30, 0.0 }
  0x6f   : > { %634 = vst.msk [vmem:[#allocation3 + $0xd0] sm:$0xff] %vm350_vm0, %v602_v23  ;;  %619 = vst.msk [vmem:[#allocation3 + $0x58] sm:$0xff] %vm350_vm0, %v587_v39  ;;  %v446_v47 = vld [vmem:[%s1911_s4 + $0xf8] sm:$0xff]  ;;  %v661_v44 = vld [vmem:[#allocation2 + $0x90] sm:$0xff]  ;;  %v509_v54 = vadd.f32 %v477_v46, %v445_v32  ;;  %v732_v0 = vsel %vm350_vm0, %v662_v33, 0.0 }
  0x70   : > { %709 = vadd.xlane.f32.xlu1 %v708_v3  ;;  %706 = vadd.xlane.f32.xlu0 %v705_v4  ;;  %620 = vst.msk [vmem:[#allocation3 + $0x60] sm:$0xff] %vm350_vm0, %v588_v31  ;;  %v478_v48 = vld [vmem:[#allocation2 + $0xf8] sm:$0xff]  ;;  %v572_v55 = vld [vmem:[#allocation3 + $0xe0] sm:$0xff]  ;;  %v573_v56 = vld [vmem:[#allocation3 + $0xe8] sm:$0xff]  ;;  %v729_v1 = vsel %vm350_vm0, %v661_v44, 0.0 }
  0x71   : > { %v510_v50 = vadd.f32 %v478_v48, %v446_v47  ;;  %v604_v57 = vmax.f32 %v572_v55, %v2063_v13  ;;  %v605_v38 = vmax.f32 %v573_v56, %v444_v17  ;;  %v557_v58 = vld [vmem:[#allocation3 + $0x68] sm:$0xff]  ;;  %v574_v41 = vld [vmem:[#allocation3 + $0xf0] sm:$0xff]  ;;  %542 = vst.msk [vmem:[#allocation2 + $0xf0] sm:$0xff] %vm350_vm0, %v509_v54  ;;  %v575_v60 = vld [vmem:[#allocation3 + $0xf8] sm:$0xff] }
  0x72   : > { %v558_v59 = vld [vmem:[#allocation3 + $0x70] sm:$0xff]  ;;  %v589_v37 = vmax.f32 %v557_v58, %v1950_v49  ;;  %v606_v34 = vmax.f32 %v574_v41, %v445_v32  ;;  %v559_v61 = vld [vmem:[#allocation3 + $0x78] sm:$0xff]  ;;  %v607_v62 = vmax.f32 %v575_v60, %v446_v47  ;;  %v1030_v49 = vld [vmem:[#allocation3 + $0x8] sm:$0xff] }
  0x73   : > { %543 = vst.msk [vmem:[#allocation2 + $0xf8] sm:$0xff] %vm350_vm0, %v510_v50  ;;  %v590_v35 = vmax.f32 %v558_v59, %v1983_v15  ;;  %636 = vst.msk [vmem:[#allocation3 + $0xe0] sm:$0xff] %vm350_vm0, %v604_v57  ;;  %v591_v63 = vmax.f32 %v559_v61, %v1956_v51  ;;  %v1029_v15 = vld [vmem:[#allocation3] sm:$0xff]  ;;  %v1064_v51 = vsel %vm350_vm0, %v1030_v49, -inf  ;;  %v1046_v3 = vld [vmem:[#allocation3 + $0x88] sm:$0xff] }
  0x74   : > { %715 = vadd.xlane.f32.xlu1 %v714_v42  ;;  %712 = vadd.xlane.f32.xlu0 %v711_v45  ;;  %637 = vst.msk [vmem:[#allocation3 + $0xe8] sm:$0xff] %vm350_vm0, %v605_v38  ;;  %621 = vst.msk [vmem:[#allocation3 + $0x68] sm:$0xff] %vm350_vm0, %v589_v37  ;;  %v1061_v2 = vsel %vm350_vm0, %v1029_v15, -inf  ;;  %v1045_v4 = vld [vmem:[#allocation3 + $0x80] sm:$0xff]  ;;  %v1112_v40 = vsel %vm350_vm0, %v1046_v3, -inf  ;;  %v1031_v5 = vld [vmem:[#allocation3 + $0x10] sm:$0xff] }
  0x75   : > { %638 = vst.msk [vmem:[#allocation3 + $0xf0] sm:$0xff] %vm350_vm0, %v606_v34  ;;  %622 = vst.msk [vmem:[#allocation3 + $0x70] sm:$0xff] %vm350_vm0, %v590_v35  ;;  %v1109_v43 = vsel %vm350_vm0, %v1045_v4, -inf  ;;  %v663_v6 = vld [vmem:[#allocation2 + $0xa0] sm:$0xff]  ;;  %v1067_v7 = vsel %vm350_vm0, %v1031_v5, -inf  ;;  %v664_v9 = vld [vmem:[#allocation2 + $0xa8] sm:$0xff] }
  0x76   : > { %639 = vst.msk [vmem:[#allocation3 + $0xf8] sm:$0xff] %vm350_vm0, %v607_v62  ;;  %623 = vst.msk [vmem:[#allocation3 + $0x78] sm:$0xff] %vm350_vm0, %v591_v63  ;;  %v735_v8 = vsel %vm350_vm0, %v663_v6, 0.0  ;;  %v1047_v10 = vld [vmem:[#allocation3 + $0x90] sm:$0xff]  ;;  %v738_v11 = vsel %vm350_vm0, %v664_v9, 0.0  ;;  %v1048_v13 = vld [vmem:[#allocation3 + $0x98] sm:$0xff] }
  0x77   : > { %v1115_v12 = vsel %vm350_vm0, %v1047_v10, -inf  ;;  %v1032_v14 = vld [vmem:[#allocation3 + $0x18] sm:$0xff]  ;;  %v1118_v16 = vsel %vm350_vm0, %v1048_v13, -inf  ;;  %v1033_v45 = vld [vmem:[#allocation3 + $0x20] sm:$0xff]  ;;  %v665_v17 = vld [vmem:[#allocation2 + $0xb0] sm:$0xff] }
  0x78   : > { %721 = vadd.xlane.f32.xlu1 %v720_v26  ;;  %718 = vadd.xlane.f32.xlu0 %v717_v27  ;;  %v1070_v42 = vsel %vm350_vm0, %v1032_v14, -inf  ;;  %v1073_v18 = vsel %vm350_vm0, %v1033_v45, -inf  ;;  %v741_v19 = vsel %vm350_vm0, %v665_v17, 0.0  ;;  %v666_v20 = vld [vmem:[#allocation2 + $0xb8] sm:$0xff]  ;;  %v1049_v21 = vld [vmem:[#allocation3 + $0xa0] sm:$0xff]  ;;  %v1050_v25 = vld [vmem:[#allocation3 + $0xa8] sm:$0xff] }
  0x79   : > { %v744_v22 = vsel %vm350_vm0, %v666_v20, 0.0  ;;  %v1121_v23 = vsel %vm350_vm0, %v1049_v21, -inf  ;;  %v1034_v26 = vld [vmem:[#allocation3 + $0x28] sm:$0xff]  ;;  %v1124_v27 = vsel %vm350_vm0, %v1050_v25, -inf  ;;  %v1035_v24 = vld [vmem:[#allocation3 + $0x30] sm:$0xff]  ;;  %v667_v29 = vld [vmem:[#allocation2 + $0xc0] sm:$0xff]  ;;  %v835_v20 = vlaneseq }
  0x7a   : > { %v1076_v28 = vsel %vm350_vm0, %v1034_v26, -inf  ;;  %v1079_v36 = vsel %vm350_vm0, %v1035_v24, -inf  ;;  %v747_v30 = vsel %vm350_vm0, %v667_v29, 0.0  ;;  %v668_v39 = vld [vmem:[#allocation2 + $0xc8] sm:$0xff]  ;;  %v1051_v31 = vld [vmem:[#allocation3 + $0xb0] sm:$0xff]  ;;  %v1052_v46 = vld [vmem:[#allocation3 + $0xb8] sm:$0xff] }
  0x7b   : > { %v750_v32 = vsel %vm350_vm0, %v668_v39, 0.0  ;;  %v1127_v33 = vsel %vm350_vm0, %v1051_v31, -inf  ;;  %v1036_v47 = vld [vmem:[#allocation3 + $0x38] sm:$0xff]  ;;  %v1130_v48 = vsel %vm350_vm0, %v1052_v46, -inf  ;;  %v669_v44 = vld [vmem:[#allocation2 + $0xd0] sm:$0xff]  ;;  %v1053_v56 = vld [vmem:[#allocation3 + $0xc0] sm:$0xff] }
  0x7c   : > { %727 = vadd.xlane.f32.xlu1 %v726_v52  ;;  %724 = vadd.xlane.f32.xlu0 %v723_v53  ;;  %v1082_v52 = vsel %vm350_vm0, %v1036_v47, -inf  ;;  %v1037_v53 = vld [vmem:[#allocation3 + $0x40] sm:$0xff]  ;;  %v753_v50 = vsel %vm350_vm0, %v669_v44, 0.0  ;;  %v670_v55 = vld [vmem:[#allocation2 + $0xd8] sm:$0xff]  ;;  %v1133_v38 = vsel %vm350_vm0, %v1053_v56, -inf  ;;  %v1054_v58 = vld [vmem:[#allocation3 + $0xc8] sm:$0xff] }
  0x7d   : > { %v1085_v54 = vsel %vm350_vm0, %v1037_v53, -inf  ;;  %v756_v57 = vsel %vm350_vm0, %v670_v55, 0.0  ;;  %v1038_v41 = vld [vmem:[#allocation3 + $0x48] sm:$0xff]  ;;  %v1136_v59 = vsel %vm350_vm0, %v1054_v58, -inf  ;;  %v1039_v34 = vld [vmem:[#allocation3 + $0x50] sm:$0xff]  ;;  %v671_v35 = vld [vmem:[#allocation2 + $0xe0] sm:$0xff] }
  0x7e   : > { %v1088_v37 = vsel %vm350_vm0, %v1038_v41, -inf  ;;  %v1091_v60 = vsel %vm350_vm0, %v1039_v34, -inf  ;;  %v759_v61 = vsel %vm350_vm0, %v671_v35, 0.0  ;;  %v672_v62 = vld [vmem:[#allocation2 + $0xe8] sm:$0xff]  ;;  %v1055_v63 = vld [vmem:[#allocation3 + $0xd0] sm:$0xff]  ;;  %v1056_v49 = vld [vmem:[#allocation3 + $0xd8] sm:$0xff] }
  0x7f   : > { %v1040_v15 = vld [vmem:[#allocation3 + $0x58] sm:$0xff]  ;;  %v1041_v3 = vld [vmem:[#allocation3 + $0x60] sm:$0xff]  ;;  %v673_v4 = vld [vmem:[#allocation2 + $0xf0] sm:$0xff]  ;;  %v2145_v21 = vand.u32 127, %v835_v20 }
  0x80   : > { %733 = vadd.xlane.f32.xlu1 %v732_v0  ;;  %730 = vadd.xlane.f32.xlu0 %v729_v1  ;;  %v762_v0 = vsel %vm350_vm0, %v672_v62, 0.0  ;;  %v1139_v1 = vsel %vm350_vm0, %v1055_v63, -inf  ;;  %v674_v5 = vld [vmem:[#allocation2 + $0xf8] sm:$0xff]  ;;  %v1057_v6 = vld [vmem:[#allocation3 + $0xe0] sm:$0xff]  ;;  %v1058_v9 = vld [vmem:[#allocation3 + $0xe8] sm:$0xff] }
  0x81   : > { %v1042_v10 = vld [vmem:[#allocation3 + $0x68] sm:$0xff]  ;;  %v1059_v13 = vld [vmem:[#allocation3 + $0xf0] sm:$0xff]  ;;  %v1060_v45 = vld [vmem:[#allocation3 + $0xf8] sm:$0xff]  ;;  %v848_v25 = vadd.s32 4294967280, %v2145_v21  ;;  %v869_v24 = vadd.s32 4294967256, %v2145_v21  ;;  %v862_v39 = vadd.s32 4294967264, %v2145_v21 }
  0x82   : > { %v1043_v14 = vld [vmem:[#allocation3 + $0x70] sm:$0xff]  ;;  %v1044_v17 = vld [vmem:[#allocation3 + $0x78] sm:$0xff]  ;;  %v883_v44 = vadd.s32 4294967240, %v2145_v21  ;;  %v876_v56 = vadd.s32 4294967248, %v2145_v21  ;;  %v890_v62 = vadd.s32 4294967232, %v2145_v21 }
  0x84   : > { %1065 = vmax.xlane.f32.xlu1 %v1064_v51  ;;  %1062 = vmax.xlane.f32.xlu0 %v1061_v2  ;;  %v1142_v51 = vsel %vm350_vm0, %v1056_v49, -inf  ;;  %v1094_v2 = vsel %vm350_vm0, %v1040_v15, -inf }
  0x88   : > { %1113 = vmax.xlane.f32.xlu1 %v1112_v40  ;;  %1110 = vmax.xlane.f32.xlu0 %v1109_v43  ;;  %v1097_v40 = vsel %vm350_vm0, %v1041_v3, -inf  ;;  %v765_v43 = vsel %vm350_vm0, %v673_v4, 0.0 }
  0x8c   : > { %1068 = vmax.xlane.f32.xlu1 %v1067_v7  ;;  %736 = vadd.xlane.f32.xlu0 %v735_v8  ;;  %v768_v7 = vsel %vm350_vm0, %v674_v5, 0.0  ;;  %v1145_v8 = vsel %vm350_vm0, %v1057_v6, -inf }
  0x90   : > { %739 = vadd.xlane.f32.xlu1 %v738_v11  ;;  %1116 = vmax.xlane.f32.xlu0 %v1115_v12  ;;  %v1148_v11 = vsel %vm350_vm0, %v1058_v9, -inf  ;;  %v1100_v12 = vsel %vm350_vm0, %v1042_v10, -inf  ;;  %v904_v9 = vadd.s32 4294967216, %v2145_v21 }
  0x94   : > { %1119 = vmax.xlane.f32.xlu1 %v1118_v16  ;;  %1071 = vmax.xlane.f32.xlu0 %v1070_v42  ;;  %v1151_v16 = vsel %vm350_vm0, %v1059_v13, -inf  ;;  %v1103_v42 = vsel %vm350_vm0, %v1043_v14, -inf }
  0x98   : > { %1074 = vmax.xlane.f32.xlu1 %v1073_v18  ;;  %742 = vadd.xlane.f32.xlu0 %v741_v19  ;;  %v1154_v18 = vsel %vm350_vm0, %v1060_v45, -inf  ;;  %v1106_v19 = vsel %vm350_vm0, %v1044_v17, -inf  ;;  %v918_v45 = vadd.s32 4294967200, %v2145_v21  ;;  %vm1025_vm0 = vcmask 1041409  }
  0x9c   : > { %745 = vadd.xlane.f32.xlu1 %v744_v22  ;;  %1122 = vmax.xlane.f32.xlu0 %v1121_v23  ;;  %v2147_v22 = vshrl.u32 %v835_v20, 7  ;;  %v841_v23 = vadd.s32 4294967288, %v2145_v21 }
  0x9e   : > { %v2155_v29 = vsub.s32 %v2145_v21, %v2147_v22  ;;  %v2162_v31 = vsub.s32 %v848_v25, %v2147_v22  ;;  %v2168_v53 = vsub.s32 %v869_v24, %v2147_v22  ;;  %v2174_v55 = vsub.s32 %v862_v39, %v2147_v22 }
  0x9f   : > { %v2190_v49 = vsub.s32 %v876_v56, %v2147_v22  ;;  %v2198_v5 = vsub.s32 %v890_v62, %v2147_v22  ;;  %v2214_v20 = vsub.s32 %v904_v9, %v2147_v22  ;;  %v2222_v39 = vsub.s32 %v918_v45, %v2147_v22 }
  0xa0   : > { %1125 = vmax.xlane.f32.xlu1 %v1124_v27  ;;  %1077 = vmax.xlane.f32.xlu0 %v1076_v28  ;;  %v855_v28 = vadd.s32 4294967272, %v2145_v21 }
  0xa2   : > { %v2165_v47 = vsub.s32 %v855_v28, %v2147_v22 }
  0xa4   : > { %1080 = vmax.xlane.f32.xlu1 %v1079_v36  ;;  %748 = vadd.xlane.f32.xlu0 %v747_v30  ;;  %v2158_v30 = vsub.s32 %v841_v23, %v2147_v22 }
  0xa8   : > { %751 = vadd.xlane.f32.xlu1 %v750_v32  ;;  %1128 = vmax.xlane.f32.xlu0 %v1127_v33 }
  0xac   : > { %1131 = vmax.xlane.f32.xlu1 %v1130_v48  ;;  %1083 = vmax.xlane.f32.xlu0 %v1082_v52 }
  0xb0   : > { %1086 = vmax.xlane.f32.xlu1 %v1085_v54  ;;  %754 = vadd.xlane.f32.xlu0 %v753_v50 }
  0xb4   : > { %757 = vadd.xlane.f32.xlu1 %v756_v57  ;;  %1134 = vmax.xlane.f32.xlu0 %v1133_v38 }
  0xb8   : > { %1137 = vmax.xlane.f32.xlu1 %v1136_v59  ;;  %1089 = vmax.xlane.f32.xlu0 %v1088_v37 }
  0xbc   : > { %1092 = vmax.xlane.f32.xlu1 %v1091_v60  ;;  %760 = vadd.xlane.f32.xlu0 %v759_v61  ;;  %v2182_v60 = vsub.s32 %v883_v44, %v2147_v22  ;;  %v897_v61 = vadd.s32 4294967224, %v2145_v21 }
  0xc0   : > { %763 = vadd.xlane.f32.xlu1 %v762_v0  ;;  %1140 = vmax.xlane.f32.xlu0 %v1139_v1 }
  0xc4   : > { %1143 = vmax.xlane.f32.xlu1 %v1142_v51  ;;  %1095 = vmax.xlane.f32.xlu0 %v1094_v2 }
  0xc8   : > { %1098 = vmax.xlane.f32.xlu1 %v1097_v40  ;;  %766 = vadd.xlane.f32.xlu0 %v765_v43  ;;  %v2195_v43 = vsub.s32 %v897_v61, %v2147_v22 }
  0xcc   : > { %769 = vadd.xlane.f32.xlu1 %v768_v7  ;;  %1146 = vmax.xlane.f32.xlu0 %v1145_v8  ;;  %v911_v8 = vadd.s32 4294967208, %v2145_v21 }
  0xd0   : > { %1149 = vmax.xlane.f32.xlu1 %v1148_v11  ;;  %1101 = vmax.xlane.f32.xlu0 %v1100_v12 }
  0xd4   : > { %1152 = vmax.xlane.f32.xlu1 %v1151_v16  ;;  %1104 = vmax.xlane.f32.xlu0 %v1103_v42  ;;  %v925_v42 = vadd.s32 4294967192, %v2145_v21 }
  0xd8   : > { %1155 = vmax.xlane.f32.xlu1 %v1154_v18  ;;  %1107 = vmax.xlane.f32.xlu0 %v1106_v19  ;;  %v2211_v19 = vsub.s32 %v911_v8, %v2147_v22 }
  0xe5   : > { %v683_v26 = vpop.xlane.xlu1 %682  ;;  %v677_v27 = vpop.xlane.xlu0 %676 }
  0xe6   : > { %v771_v36 = vmul.f32 0.015625, %v677_v27  ;;  %v773_v32 = vmul.f32 0.015625, %v683_v26 }
  0xe8   : > { %v840_v54 = vrot.slane %v771_v36, %v2155_v29  ;;  %v852_v57 = vrot.slane %v773_v32, %v2162_v31  ;;  %v2219_v36 = vsub.s32 %v925_v42, %v2147_v22 }
  0xe9   : > { %v686_v33 = vpop.xlane.xlu1 %685  ;;  %v680_v46 = vpop.xlane.xlu0 %679 }
  0xea   : > { %v774_v48 = vmul.f32 0.015625, %v686_v33  ;;  %v772_v52 = vmul.f32 0.015625, %v680_v46  ;;  %v939_v46 = vadd.s32 4294967176, %v2145_v21 }
  0xec   : > { %v845_v50 = vrot.slane %v772_v52, %v2158_v30  ;;  %v859_v41 = vrot.slane %v774_v48, %v2165_v47  ;;  %v932_v48 = vadd.s32 4294967184, %v2145_v21 }
  0xed   : > { %v692_v38 = vpop.xlane.xlu1 %691  ;;  %v689_v58 = vpop.xlane.xlu0 %688 }
  0xee   : > { %v847_v59 = vsel %vm846_vm1, %v845_v50, %v840_v54  ;;  %v776_v37 = vmul.f32 0.015625, %v692_v38  ;;  %v775_v34 = vmul.f32 0.015625, %v689_v58 }
  0xef   : > { %v854_v35 = vsel %vm853_vm2, %v852_v57, %v847_v59  ;;  %v2236_v59 = vsub.s32 %v932_v48, %v2147_v22 }
  0xf0   : > { %v873_v63 = vrot.slane %v776_v37, %v2168_v53  ;;  %v861_v0 = vsel %vm860_vm3, %v859_v41, %v854_v35  ;;  %v866_v1 = vrot.slane %v775_v34, %v2174_v55  ;;  %v2233_v41 = vsub.s32 %v939_v46, %v2147_v22 }
  0xf1   : > { %v698_v15 = vpop.xlane.xlu1 %697  ;;  %v695_v51 = vpop.xlane.xlu0 %694 }
  0xf2   : > { %v868_v2 = vsel %vm867_vm4, %v866_v1, %v861_v0  ;;  %v778_v3 = vmul.f32 0.015625, %v698_v15  ;;  %v777_v4 = vmul.f32 0.015625, %v695_v51 }
  0xf3   : > { %v875_v40 = vsel %vm874_vm5, %v873_v63, %v868_v2 }
  0xf4   : > { %v887_v6 = vrot.slane %v778_v3, %v2182_v60  ;;  %v880_v7 = vrot.slane %v777_v4, %v2190_v49 }
  0xf5   : > { %v704_v10 = vpop.xlane.xlu1 %703  ;;  %v701_v11 = vpop.xlane.xlu0 %700 }
  0xf6   : > { %v882_v12 = vsel %vm881_vm6, %v880_v7, %v875_v40  ;;  %v780_v13 = vmul.f32 0.015625, %v704_v10  ;;  %v779_v14 = vmul.f32 0.015625, %v701_v11 }
  0xf7   : > { %v889_v16 = vsel %vm888_vm7, %v887_v6, %v882_v12 }
  0xf8   : > { %v901_v17 = vrot.slane %v780_v13, %v2195_v43  ;;  %v894_v18 = vrot.slane %v779_v14, %v2198_v5 }
  0xf9   : > { %v710_v23 = vpop.xlane.xlu1 %709  ;;  %v707_v25 = vpop.xlane.xlu0 %706 }
  0xfa   : > { %v896_v26 = vsel %vm895_vm8, %v894_v18, %v889_v16  ;;  %v782_v27 = vmul.f32 0.015625, %v710_v23  ;;  %v781_v28 = vmul.f32 0.015625, %v707_v25 }
  0xfb   : > { %v903_v24 = vsel %vm902_vm9, %v901_v17, %v896_v26 }
  0xfc   : > { %v915_v32 = vrot.slane %v782_v27, %v2211_v19  ;;  %v908_v33 = vrot.slane %v781_v28, %v2214_v20 }
  0xfd   : > { %v716_v52 = vpop.xlane.xlu1 %715  ;;  %v713_v44 = vpop.xlane.xlu0 %712 }
  0xfe   : > { %v910_v54 = vsel %vm909_vm10, %v908_v33, %v903_v24  ;;  %v784_v50 = vmul.f32 0.015625, %v716_v52  ;;  %v783_v56 = vmul.f32 0.015625, %v713_v44 }
  0xff   : > { %v917_v57 = vsel %vm916_vm11, %v915_v32, %v910_v54 }
 0x100   : > { %v929_v38 = vrot.slane %v784_v50, %v2219_v36  ;;  %v922_v58 = vrot.slane %v783_v56, %v2222_v39 }
 0x101   : > { %v722_v21 = vpop.xlane.xlu1 %721  ;;  %v719_v37 = vpop.xlane.xlu0 %718 }
 0x102   : > { %v924_v34 = vsel %vm923_vm12, %v922_v58, %v917_v57  ;;  %v786_v35 = vmul.f32 0.015625, %v722_v21  ;;  %v785_v61 = vmul.f32 0.015625, %v719_v37 }
 0x103   : > { %v931_v62 = vsel %vm930_vm13, %v929_v38, %v924_v34 }
 0x104   : > { %v943_v63 = vrot.slane %v786_v35, %v2233_v41  ;;  %v936_v0 = vrot.slane %v785_v61, %v2236_v59 }
 0x105   : > { %v728_v1 = vpop.xlane.xlu1 %727  ;;  %v725_v15 = vpop.xlane.xlu0 %724 }
 0x106   : > { %v938_v51 = vsel %vm937_vm14, %v936_v0, %v931_v62  ;;  %v788_v22 = vmul.f32 0.015625, %v728_v1  ;;  %v787_v2 = vmul.f32 0.015625, %v725_v15 }
 0x107   : > { %v2244_v3 = vsel %vm944_vm15, %v943_v63, %v938_v51 }
 0x108   : > { %v953_v4 = vrot.slane %v788_v22, %v2158_v30  ;;  %v949_v40 = vrot.slane %v787_v2, %v2155_v29 }
 0x109   : > { %v734_v6 = vpop.xlane.xlu1 %733  ;;  %v731_v7 = vpop.xlane.xlu0 %730 }
 0x10a   : > { %v954_v8 = vsel %vm846_vm1, %v953_v4, %v949_v40  ;;  %v790_v9 = vmul.f32 0.015625, %v734_v6  ;;  %v789_v10 = vmul.f32 0.015625, %v731_v7 }
 0x10c   : > { %v963_v11 = vrot.slane %v790_v9, %v2165_v47  ;;  %v958_v12 = vrot.slane %v789_v10, %v2162_v31 }
 0x10d   : > { %v1066_v13 = vpop.xlane.xlu1 %1065  ;;  %v1063_v14 = vpop.xlane.xlu0 %1062 }
 0x10e   : > { %v959_v16 = vsel %vm853_vm2, %v958_v12, %v954_v8  ;;  %v1196_v42 = vrot.slane %v1066_v13, %v2158_v30  ;;  %v1192_v45 = vrot.slane %v1063_v14, %v2155_v29 }
 0x10f   : > { %v964_v17 = vsel %vm860_vm3, %v963_v11, %v959_v16 }
 0x110   : > { %v2256_v18 = vsel %vm846_vm1, %v1196_v42, %v1192_v45 }
 0x111   : > { %v1114_v23 = vpop.xlane.xlu1 %1113  ;;  %v1111_v25 = vpop.xlane.xlu0 %1110 }
 0x112   : > { %v1275_v26 = vrot.slane %v1114_v23, %v2158_v30  ;;  %v1271_v27 = vrot.slane %v1111_v25, %v2155_v29 }
 0x114   : > { %v1276_v28 = vsel %vm846_vm1, %v1275_v26, %v1271_v27 }
 0x115   : > { %v2261_v24 = vpop.xlane.xlu1 %1068  ;;  %v737_v32 = vpop.xlane.xlu0 %736 }
 0x116   : > { %v791_v22 = vmul.f32 0.015625, %v737_v32  ;;  %v1201_v25 = vrot.slane %v2261_v24, %v2162_v31 }
 0x118   : > { %v968_v8 = vrot.slane %v791_v22, %v2174_v55 }
 0x119   : > { %v740_v33 = vpop.xlane.xlu1 %739  ;;  %v1117_v46 = vpop.xlane.xlu0 %1116 }
 0x11a   : > { %v792_v2 = vmul.f32 0.015625, %v740_v33  ;;  %v1280_v12 = vrot.slane %v1117_v46, %v2162_v31  ;;  %v969_v26 = vsel %vm867_vm4, %v968_v8, %v964_v17 }
 0x11c   : > { %v973_v10 = vrot.slane %v792_v2, %v2168_v53 }
 0x11d   : > { %v2263_v48 = vpop.xlane.xlu1 %1119  ;;  %v2265_v52 = vpop.xlane.xlu0 %1071 }
 0x11e   : > { %v974_v33 = vsel %vm874_vm5, %v973_v10, %v969_v26  ;;  %v1285_v46 = vrot.slane %v2263_v48, %v2165_v47  ;;  %v1206_v31 = vrot.slane %v2265_v52, %v2165_v47 }
 0x121   : > { %v2267_v44 = vpop.xlane.xlu1 %1074  ;;  %v743_v54 = vpop.xlane.xlu0 %742 }
 0x122   : > { %v793_v4 = vmul.f32 0.015625, %v743_v54 }
 0x124   : > { %v978_v13 = vrot.slane %v793_v4, %v2190_v49  ;;  %v1202_v4 = vsel %vm853_vm2, %v1201_v25, %v2256_v18 }
 0x125   : > { %v746_v50 = vpop.xlane.xlu1 %745  ;;  %v2269_v56 = vpop.xlane.xlu0 %1122 }
 0x126   : > { %v794_v7 = vmul.f32 0.015625, %v746_v50  ;;  %v979_v17 = vsel %vm881_vm6, %v978_v13, %v974_v33  ;;  %v1290_v48 = vrot.slane %v2269_v56, %v2174_v55 }
 0x128   : > { %v983_v45 = vrot.slane %v794_v7, %v2182_v60 }
 0x129   : > { %v2271_v30 = vpop.xlane.xlu1 %1125  ;;  %v2273_v29 = vpop.xlane.xlu0 %1077 }
 0x12a   : > { %v1295_v47 = vrot.slane %v2271_v30, %v2168_v53 }
 0x12d   : > { %v2275_v57 = vpop.xlane.xlu1 %1080  ;;  %v749_v38 = vpop.xlane.xlu0 %748 }
 0x12e   : > { %v795_v9 = vmul.f32 0.015625, %v749_v38  ;;  %v1281_v38 = vsel %vm853_vm2, %v1280_v12, %v1276_v28  ;;  %v1211_v28 = vrot.slane %v2267_v44, %v2174_v55  ;;  %v1207_v55 = vsel %vm860_vm3, %v1206_v31, %v1202_v4 }
 0x12f   : > { %v1216_v44 = vrot.slane %v2273_v29, %v2168_v53 }
 0x130   : > { %v988_v27 = vrot.slane %v795_v9, %v2198_v5 }
 0x131   : > { %v752_v58 = vpop.xlane.xlu1 %751  ;;  %v2277_v21 = vpop.xlane.xlu0 %1128 }
 0x132   : > { %v796_v11 = vmul.f32 0.015625, %v752_v58  ;;  %v1300_v53 = vrot.slane %v2277_v21, %v2190_v49 }
 0x134   : > { %v993_v54 = vrot.slane %v796_v11, %v2195_v43  ;;  %v1221_v11 = vrot.slane %v2275_v57, %v2190_v49 }
 0x135   : > { %v2279_v37 = vpop.xlane.xlu1 %1131  ;;  %v2281_v34 = vpop.xlane.xlu0 %1083 }
 0x136   : > { %v1305_v57 = vrot.slane %v2279_v37, %v2182_v60 }
 0x139   : > { %v2283_v35 = vpop.xlane.xlu1 %1086  ;;  %v755_v61 = vpop.xlane.xlu0 %754 }
 0x13a   : > { %v797_v14 = vmul.f32 0.015625, %v755_v61  ;;  %v1231_v49 = vrot.slane %v2283_v35, %v2198_v5 }
 0x13c   : > { %v998_v24 = vrot.slane %v797_v14, %v2214_v20  ;;  %v1212_v14 = vsel %vm867_vm4, %v1211_v28, %v1207_v55 }
 0x13d   : > { %v758_v62 = vpop.xlane.xlu1 %757  ;;  %v2285_v63 = vpop.xlane.xlu0 %1134 }
 0x13e   : > { %v798_v23 = vmul.f32 0.015625, %v758_v62  ;;  %v984_v62 = vsel %vm888_vm7, %v983_v45, %v979_v17  ;;  %v1310_v21 = vrot.slane %v2285_v63, %v2198_v5 }
 0x13f   : > { %v989_v52 = vsel %vm895_vm8, %v988_v27, %v984_v62  ;;  %v1217_v27 = vsel %vm874_vm5, %v1216_v44, %v1212_v14 }
 0x140   : > { %v994_v56 = vsel %vm902_vm9, %v993_v54, %v989_v52 }
 0x141   : > { %v2287_v0 = vpop.xlane.xlu1 %1137  ;;  %v2289_v1 = vpop.xlane.xlu0 %1089  ;;  %v999_v30 = vsel %vm909_vm10, %v998_v24, %v994_v56 }
 0x145   : > { %v2291_v15 = vpop.xlane.xlu1 %1092  ;;  %v761_v51 = vpop.xlane.xlu0 %760 }
 0x146   : > { %v799_v32 = vmul.f32 0.015625, %v761_v51  ;;  %v1003_v51 = vrot.slane %v798_v23, %v2211_v19  ;;  %v1226_v23 = vrot.slane %v2281_v34, %v2182_v60  ;;  %v1222_v60 = vsel %vm881_vm6, %v1221_v11, %v1217_v27 }
 0x147   : > { %v1315_v34 = vrot.slane %v2287_v0, %v2195_v43  ;;  %v1241_v35 = vrot.slane %v2291_v15, %v2214_v20 }
 0x148   : > { %v1008_v2 = vrot.slane %v799_v32, %v2222_v39  ;;  %v1004_v12 = vsel %vm916_vm11, %v1003_v51, %v999_v30 }
 0x149   : > { %v764_v40 = vpop.xlane.xlu1 %763  ;;  %v2293_v6 = vpop.xlane.xlu0 %1140 }
 0x14a   : > { %v800_v50 = vmul.f32 0.015625, %v764_v40  ;;  %v1286_v40 = vsel %vm860_vm3, %v1285_v46, %v1281_v38  ;;  %v1009_v29 = vsel %vm923_vm12, %v1008_v2, %v1004_v12  ;;  %v1236_v46 = vrot.slane %v2289_v1, %v2195_v43 }
 0x14b   : > { %v1291_v18 = vsel %vm867_vm4, %v1290_v48, %v1286_v40  ;;  %v1320_v43 = vrot.slane %v2293_v6, %v2214_v20  ;;  %v1227_v1 = vsel %vm888_vm7, %v1226_v23, %v1222_v60 }
 0x14c   : > { %v1013_v7 = vrot.slane %v800_v50, %v2219_v36  ;;  %v1296_v45 = vsel %vm874_vm5, %v1295_v47, %v1291_v18  ;;  %v1232_v15 = vsel %vm895_vm8, %v1231_v49, %v1227_v1 }
 0x14d   : > { %v2299_v16 = vpop.xlane.xlu1 %1143  ;;  %v2301_v42 = vpop.xlane.xlu0 %1095  ;;  %v1301_v5 = vsel %vm881_vm6, %v1300_v53, %v1296_v45 }
 0x14e   : > { %v1014_v25 = vsel %vm930_vm13, %v1013_v7, %v1009_v29  ;;  %v1306_v0 = vsel %vm888_vm7, %v1305_v57, %v1301_v5  ;;  %v1325_v50 = vrot.slane %v2299_v16, %v2211_v19  ;;  %v1246_v38 = vrot.slane %v2301_v42, %v2211_v19 }
 0x14f   : > { %v1311_v20 = vsel %vm895_vm8, %v1310_v21, %v1306_v0 }
 0x151   : > { %v2317_v58 = vpop.xlane.xlu1 %1098  ;;  %v767_v61 = vpop.xlane.xlu0 %766 }
 0x152   : > { %v801_v22 = vmul.f32 0.015625, %v767_v61  ;;  %v1251_v6 = vrot.slane %v2317_v58, %v2222_v39 }
 0x154   : > { %v1018_v8 = vrot.slane %v801_v22, %v2236_v59 }
 0x155   : > { %v770_v9 = vpop.xlane.xlu1 %769  ;;  %v2340_v10 = vpop.xlane.xlu0 %1146 }
 0x156   : > { %v802_v13 = vmul.f32 0.015625, %v770_v9  ;;  %v1019_v32 = vsel %vm937_vm14, %v1018_v8, %v1014_v25 }
 0x158   : > { %v1023_v26 = vrot.slane %v802_v13, %v2233_v41 }
 0x159   : > { %v2366_v33 = vpop.xlane.xlu1 %1149  ;;  %v2368_v37 = vpop.xlane.xlu0 %1101 }
 0x15a   : > { %v1024_v54 = vsel %vm944_vm15, %v1023_v26, %v1019_v32 }
 0x15b   : > { %v1026_v63 = vsel %vm1025_vm0, %v1024_v54, %v2244_v3  ;;  %v1330_v3 = vrot.slane %v2340_v10, %v2222_v39 }
 0x15c   : > { %1028 = vst [vmem:[%s336_s7] sm:$0x3] %v1026_v63 }
 0x15d   : > { %v1153_v31 = vpop.xlane.xlu1 %1152  ;;  %v1105_v17 = vpop.xlane.xlu0 %1104 }
 0x15e   : > { %1595 = shalt.err (!%p1592_p7)
}
 0x15f   : > { %s1596_s27 = scalar_lea.hbm %s2381_s18, 32  ;;  %s1600_s3 = scalar_lea.hbm %s2498_s1, 64 }
 0x160   : > { %p1597_p8 = scmp.ne.s32.totalorder %s2381_s18, %s1596_s27  ;;  %p1601_p13 = scmp.lt.s32.totalorder %s2381_s18, %s2498_s1 }
 0x161   : > { %p1602_p0 = scmp.lt.s32.totalorder %s1600_s3, %s1596_s27 }
 0x162   : > { %p1598_p11 = pnand %p1597_p8, %p1748_p5 }
 0x163   : > { %p1603_p1 = por %p1602_p0, %p1601_p13 }
 0x164   : > { %p1599_p12 = pneg %p1598_p11 }
 0x166   : > { %p1604_p2 = pnand %p1603_p1, %p1599_p12 }
 0x168   : > { %1607 = shalt.err (!%p1604_p2)
}
 0x169   : > { %1520 = dma.vmem_to_hbm [thread:$0]  (%p1748_p5), %s2383_s8, 32, %s2381_s18, %s1351_s20   ;;  %v1316_v19 = vsel %vm902_vm9, %v1315_v34, %v1311_v20  ;;  %v1237_v39 = vsel %vm902_vm9, %v1236_v46, %v1232_v15  ;;  %v1335_v16 = vrot.slane %v2366_v33, %v2219_v36  ;;  %v1256_v42 = vrot.slane %v2368_v37, %v2219_v36  ;;  %v1156_v47 = vpop.xlane.xlu1 %1155  ;;  %v1108_v36 = vpop.xlane.xlu0 %1107 }
 0x16a   : > { %v1242_v24 = vsel %vm909_vm10, %v1241_v35, %v1237_v39  ;;  %v1321_v58 = vsel %vm909_vm10, %v1320_v43, %v1316_v19  ;;  %v1340_v61 = vrot.slane %v1153_v31, %v2236_v59  ;;  %v1261_v62 = vrot.slane %v1105_v17, %v2236_v59  ;;  %s343_s8 = scalar_lea.vmem [#allocation7], %s1511_s5  ;;  %s2454_s18 = scalar_lea.hbm %s2499_s2, %s1515_s6 }
 0x16b   : > { %v1326_v48 = vsel %vm916_vm11, %v1325_v50, %v1321_v58  ;;  %v1247_v51 = vsel %vm916_vm11, %v1246_v38, %v1242_v24  ;;  %s1386_s15 = sshll.u32 %s343_s8, 4  ;;  %v1345_v2 = vrot.slane %v1156_v47, %v2233_v41  ;;  %v1266_v4 = vrot.slane %v1108_v36, %v2233_v41  ;;  %s1356_s20 = scalar_lea.sflag [#allocation8], %s1842_s30  ;;  %s1387_s15 = int_to_ptr.vmem [resolvable:$true] %s1386_s15 }
 0x16c   : > { %v1252_v22 = vsel %vm923_vm12, %v1251_v6, %v1247_v51  ;;  %v1331_v28 = vsel %vm923_vm12, %v1330_v3, %v1326_v48  ;;  %s1608_s23 = scalar_lea.vmem %s1387_s15, 32  ;;  %s1693_s24 = smov [#allocation7]  }
 0x16d   : > { %v1336_v52 = vsel %vm930_vm13, %v1335_v16, %v1331_v28  ;;  %v1257_v59 = vsel %vm930_vm13, %v1256_v42, %v1252_v22  ;;  %p1609_p3 = scmp.ne.s32.totalorder %s1387_s15, %s1608_s23  ;;  %s1612_s25 = sshll.u32 %s1693_s24, 4  ;;  %s1613_s25 = int_to_ptr.vmem [resolvable:$false] %s1612_s25 }
 0x16e   : > { %v1341_v40 = vsel %vm937_vm14, %v1340_v61, %v1336_v52  ;;  %v1262_v56 = vsel %vm937_vm14, %v1261_v62, %v1257_v59  ;;  %s1614_s26 = scalar_lea.vmem %s1613_s25, 64  ;;  %p1615_p7 = scmp.lt.s32.totalorder %s1387_s15, %s1613_s25 }
 0x16f   : > { %v1346_v7 = vsel %vm944_vm15, %v1345_v2, %v1341_v40  ;;  %v1267_v55 = vsel %vm944_vm15, %v1266_v4, %v1262_v56  ;;  %p1610_p4 = pnand %p1609_p3, %p1748_p5  ;;  %p1616_p8 = scmp.lt.s32.totalorder %s1614_s26, %s1608_s23 }
 0x170   : > { %v1347_v44 = vsel %vm1025_vm0, %v1346_v7, %v1267_v55 }
 0x171   : > { %1349 = vst [vmem:[%s343_s8] sm:$0x3] %v1347_v44  ;;  %p1611_p6 = pneg %p1610_p4  ;;  %p1617_p11 = por %p1616_p8, %p1615_p7 }
 0x173   : > { %p1618_p12 = pnand %p1617_p11, %p1611_p6 }
 0x175   : > { %1621 = shalt.err (!%p1618_p12)
}
 0x176   : > { %s1622_s12 = scalar_lea.hbm %s2454_s18, 32  ;;  %s1626_s27 = scalar_lea.hbm %s2499_s2, 64 }
 0x177   : > { %p1623_p13 = scmp.ne.s32.totalorder %s2454_s18, %s1622_s12  ;;  %p1627_p2 = scmp.lt.s32.totalorder %s2454_s18, %s2499_s2 }
 0x178   : > { %p1628_p3 = scmp.lt.s32.totalorder %s1626_s27, %s1622_s12 }
 0x179   : > { %p1624_p0 = pnand %p1623_p13, %p1748_p5 }
 0x17a   : > { %p1629_p4 = por %p1628_p3, %p1627_p2 }
 0x17b   : > { %p1625_p1 = pneg %p1624_p0 }
 0x17d   : > { %p1630_p6 = pnand %p1629_p4, %p1625_p1 }
 0x17f   : > { %1633 = shalt.err (!%p1630_p6)
}
 0x180   : > { %1521 = dma.vmem_to_hbm [thread:$0]  (%p1748_p5), %s1387_s15, 32, %s2454_s18, %s1356_s20  }
 0x181 PF: > { %s1398_s3 = sand.u32 1, %s1668_s9   ;;  %p1525_p7 = pnand %p1505_p10, %p1759_p9 }
 0x182   : > { %s1399_s4 = scalar_lea.sflag [#allocation6], %s1398_s3 }
 0x183   : > { %p1526_p8 = pneg %p1525_p7 }
 0x185   : > { %1659 = dma.done.wait (%p1526_p8), %s1399_s4, 32  }
 0x186   : > { %1661 = vsyncadd (%p1526_p8), %s1399_s4, 4294967264  ;;  %s1408_s7 = scalar_lea.sflag [#allocation8], %s1398_s3 }
 0x187   : > { %1663 = dma.done.wait (%p1526_p8), %s1408_s7, 32  }
 0x188   : > { %1665 = vsyncadd (%p1526_p8), %s1408_s7, 4294967264  ;;  %s19_s14 = sadd.s32 1, %s1688_s14   ;;  %s2502_s9 = smov %s1672_s10 }
 0x189   : > { %p16_p11 = scmp.ge.s32.totalorder %s19_s14, 4   ;;  %s2503_s10 = smov %s1676_s11 }
 0x18a   : > { %s2504_s11 = smov %s1757_s21  ;;  %s2505_s12 = smov %s1684_s13 }
 0x18b   : > { %s2506_s13 = smov %s2508_s17  ;;  %18 = sbr.rel (!%p16_p11) target bundleno = 6 (0x6), region = 127 }
 0x190   :  { %1413 = vsyncpa [#allocation6], 1 }
 0x191   :  { %1415 = vsyncpa [#allocation6 + $0x1], 1 }
 0x192   :  { %1416 = vsyncpa [#allocation8], 1 }
 0x193   :  { %1418 = vsyncpa [#allocation8 + $0x1], 1 }

</bundles_post_ra>
